<compile_context>
chip_gen: v7x
topology: tpu7x:2x2x1
jax: 0.10.0
libtpu: 0.0.40
codegen_flags: <defaults>
</compile_context>

<pallas_src>
import functools

import jax
import jax.numpy as jnp
from jax import lax
from jax.experimental import pallas as pl
from jax.experimental.pallas import tpu as pltpu


# --------------------------------------------------------------------------- #
# Pass 1: Bernoulli mask + separable max-pool dilation + partial keep-sum.
# --------------------------------------------------------------------------- #
def _shift_zero(a, s, axis):
    """out[..., i, ...] = a[..., i + s, ...]  (static shift, zero fill at edges)."""
    if s == 0:
        return a
    n = a.shape[axis]
    fill = jnp.zeros_like(lax.slice_in_dim(a, 0, abs(s), axis=axis))
    if s > 0:
        body = lax.slice_in_dim(a, s, n, axis=axis)
        return jnp.concatenate([body, fill], axis=axis)
    body = lax.slice_in_dim(a, 0, n + s, axis=axis)
    return jnp.concatenate([fill, body], axis=axis)


def _mask_kernel(bits_ref, keep_ref, psum_ref, *, thr_s32, k):
    p = k // 2
    # Integer-threshold Bernoulli draw: P(bits < thr) == gamma.
    bern = (bits_ref[...] < thr_s32).astype(jnp.float32)            # (bc, H, W)

    # max_pool2d(bern, k, stride=1, pad=p) of a 0/1 mask == OR of shifted copies;
    # separable: k shifts along W (lanes), then k shifts along H (sublanes).
    # Pure VPU/XLU work, MXU stays free.
    pw = bern
    for d in range(1, p + 1):                                        # W axis
        pw = jnp.maximum(pw, _shift_zero(bern, d, 2))
        pw = jnp.maximum(pw, _shift_zero(bern, -d, 2))
    pooled = pw
    for d in range(1, p + 1):                                        # H axis
        pooled = jnp.maximum(pooled, _shift_zero(pw, d, 1))
        pooled = jnp.maximum(pooled, _shift_zero(pw, -d, 1))

    keep = 1.0 - pooled
    keep_ref[...] = keep.astype(keep_ref.dtype)                      # int8 keep mask
    # Per-tile partial sum, broadcast into one aligned (8,128) block.
    psum_ref[...] = jnp.full(psum_ref.shape, jnp.sum(keep), dtype=jnp.float32)


# --------------------------------------------------------------------------- #
# Pass 2: lane-dense streaming apply  out = x * keep * scale  (in x.dtype).
# --------------------------------------------------------------------------- #
def _apply_kernel(scale_ref, x_ref, keep_ref, out_ref):
    s = scale_ref[0].astype(x_ref.dtype)
    keep = keep_ref[...].astype(x_ref.dtype)
    out_ref[...] = x_ref[...] * keep * s


# --------------------------------------------------------------------------- #
# Wrapper.
# --------------------------------------------------------------------------- #
def _largest_divisor_not_above(n, cap):
    cap = max(1, min(n, cap))
    for t in range(cap, 0, -1):
        if n % t == 0:
            return t
    return 1


def _lane_dense_shape(total, bc, h, w):
    """Pick a 2-D flat view with a lane-dense (multiple-of-128) last dim."""
    for cols in (512, 256, 128):
        if total % cols == 0:
            return total // cols, cols
    return bc * h, w            # fallback: original (BC*H, W) view


def drop_block_fast_2d_pallas(x, key, drop_prob=0.1, block_size=7,
                              gamma_scale=1.0):
    """Pallas port of timm drop_block_fast_2d (with_noise=False, batchwise=False)."""
    B, C, H, W = x.shape
    cbs = min(block_size, min(W, H))             # clipped block size
    if cbs % 2 != 1:
        raise NotImplementedError(
            "clipped block size must be odd (even sizes break the spatial shape "
            "in the torch fast path as well)")
    denom = (W - block_size + 1) * (H - block_size + 1)
    if denom <= 0:
        raise ValueError("block_size too large for feature map: gamma undefined")
    gamma = gamma_scale * drop_prob * (H * W) / (cbs ** 2) / denom
    # uint32 threshold expressed in signed-int32 space (u <u t  <=>  u^msb <s t^msb)
    thr_u = int(max(0, min(2 ** 32 - 1, round(gamma * (2 ** 32)))))
    thr_s = thr_u - 2 ** 31

    BC = B * C
    total = B * C * H * W

    bits = jax.random.bits(key, (BC, H, W), jnp.uint32)
    bits = lax.bitcast_convert_type(bits, jnp.int32)

    # ------------------ pass 1: keep mask (int8) + partial sums --------------
    bc_tile = _largest_divisor_not_above(BC, max(1, (1 << 18) // (H * W)))
    n_tiles = BC // bc_tile

    keep, psums = pl.pallas_call(
        functools.partial(_mask_kernel, thr_s32=thr_s, k=cbs),
        grid=(n_tiles,),
        in_specs=[pl.BlockSpec((bc_tile, H, W), lambda i: (i, 0, 0))],
        out_specs=[
            pl.BlockSpec((bc_tile, H, W), lambda i: (i, 0, 0)),
            pl.BlockSpec((1, 8, 128), lambda i: (i, 0, 0)),
        ],
        out_shape=[
            jax.ShapeDtypeStruct((BC, H, W), jnp.int8),
            jax.ShapeDtypeStruct((n_tiles, 8, 128), jnp.float32),
        ],
        compiler_params=pltpu.CompilerParams(
            dimension_semantics=("parallel",),
            vmem_limit_bytes=32 * 1024 * 1024),
    )(bits)

    scale = (float(total) / (jnp.sum(psums[:, 0, 0]) + 1e-7)).astype(jnp.float32)
    scale = scale.reshape(1)

    # ------------------ pass 2: lane-dense streaming apply -------------------
    n_rows, n_cols = _lane_dense_shape(total, BC, H, W)
    x_flat = x.reshape(n_rows, n_cols)
    keep_flat = keep.reshape(n_rows, n_cols)

    row_cap = max(8, ((1 << 21) // (n_cols * x.dtype.itemsize)) // 8 * 8)
    row_tile = n_rows if n_rows <= row_cap else row_cap     # full, or multiple of 8

    out_flat = pl.pallas_call(
        _apply_kernel,
        grid_spec=pltpu.PrefetchScalarGridSpec(
            num_scalar_prefetch=1,                           # `scale` -> SMEM
            grid=(pl.cdiv(n_rows, row_tile),),
            in_specs=[pl.BlockSpec((row_tile, n_cols), lambda i, s: (i, 0)),
                      pl.BlockSpec((row_tile, n_cols), lambda i, s: (i, 0))],
            out_specs=pl.BlockSpec((row_tile, n_cols), lambda i, s: (i, 0)),
        ),
        out_shape=jax.ShapeDtypeStruct((n_rows, n_cols), x.dtype),
        compiler_params=pltpu.CompilerParams(
            dimension_semantics=("parallel",),
            vmem_limit_bytes=32 * 1024 * 1024),
    )(scale, x_flat, keep_flat)

    return out_flat.reshape(B, C, H, W)


class DropBlock2d:
    """Pallas port of timm's DropBlock2d (fast path) forward pass."""

    def __init__(self, drop_prob=0.1, block_size=7, gamma_scale=1.0,
                 with_noise=False, inplace=False, batchwise=False, fast=True):
        self.drop_prob = drop_prob
        self.gamma_scale = gamma_scale
        self.block_size = block_size
        self.with_noise = with_noise
        self.inplace = inplace
        self.batchwise = batchwise
        self.fast = fast
        self.training = True

    def __call__(self, x, key):
        if not self.training or not self.drop_prob:
            return x
        if self.with_noise or self.batchwise or not self.fast:
            # TODO(synk): with_noise / batchwise / slow (valid-block) variants are
            # not kernelized (the default config uses none of them).
            raise NotImplementedError(
                "only fast=True, with_noise=False, batchwise=False is kernelized")
        return drop_block_fast_2d_pallas(x, key, self.drop_prob,
                                         self.block_size, self.gamma_scale)


# --------------------------------------------------------------------------- #
# Self-check.
# --------------------------------------------------------------------------- #
def _reference(x, key, drop_prob, block_size, gamma_scale):
    """Pure-JAX reference using the same bits / integer threshold."""
    B, C, H, W = x.shape
    cbs = min(block_size, min(W, H))
    gamma = gamma_scale * drop_prob * (H * W) / (cbs ** 2) / (
        (W - block_size + 1) * (H - block_size + 1))
    thr_u = int(max(0, min(2 ** 32 - 1, round(gamma * (2 ** 32)))))
    thr_s = thr_u - 2 ** 31
    bits = lax.bitcast_convert_type(
        jax.random.bits(key, (B * C, H, W), jnp.uint32), jnp.int32)
    bern = (bits < thr_s).astype(jnp.float32).reshape(B, C, H, W)
    p = cbs // 2
    pooled = lax.reduce_window(bern, 0.0, lax.max,
                               (1, 1, cbs, cbs), (1, 1, 1, 1),
                               ((0, 0), (0, 0), (p, p), (p, p)))
    keep = 1.0 - pooled
    scale = keep.size / (jnp.sum(keep) + 1e-7)
    return (x * keep.astype(x.dtype) * scale.astype(x.dtype)).astype(x.dtype)


if __name__ == "__main__":
    kx, kn = jax.random.split(jax.random.PRNGKey(0))
    x = jax.random.normal(kx, (2, 4, 16, 16), dtype=jnp.float32)

    mod = DropBlock2d(drop_prob=0.1, block_size=7)
    y = jax.block_until_ready(mod(x, kn))

    assert y.shape == x.shape and y.dtype == x.dtype
    assert bool(jnp.all(jnp.isfinite(y)))

    y_ref = _reference(x, kn, mod.drop_prob, mod.block_size, mod.gamma_scale)
    assert bool(jnp.allclose(y, y_ref, rtol=1e-3, atol=1e-3)), (
        "max abs diff = %g" % float(jnp.max(jnp.abs(y - y_ref))))

    print("KERNEL_OK")
</pallas_src>

<mosaic_0001>
module attributes {stable_mosaic.version = 11 : i64} {
  func.func @_mask_kernel(%arg0: i32, %arg1: memref<8x16x16xi32, #tpu.memory_space<vmem>>, %arg2: memref<8x16x16xi8, #tpu.memory_space<vmem>>, %arg3: memref<1x8x128xf32, #tpu.memory_space<vmem>>) attributes {dimension_semantics = [#tpu.dimension_semantics<parallel>], iteration_bounds = array<i64: 1>, scalar_prefetch = 0 : i64, scratch_operands = 0 : i64, tpu.core_type = #tpu.core_type<tc>, window_params = [{transform_indices = @transform_0, window_bounds = array<i64: 8, 16, 16>}, {transform_indices = @transform_1, window_bounds = array<i64: 8, 16, 16>}, {transform_indices = @transform_2, window_bounds = array<i64: 1, 8, 128>}]} {
    %c0 = arith.constant 0 : index
    %c0_0 = arith.constant 0 : index
    %c0_1 = arith.constant 0 : index
    %0 = vector.load %arg1[%c0, %c0_0, %c0_1] : memref<8x16x16xi32, #tpu.memory_space<vmem>>, vector<8x16x16xi32>
    %c-2125044635_i32 = arith.constant -2125044635 : i32
    %1 = vector.broadcast %c-2125044635_i32 : i32 to vector<8x16x16xi32>
    %2 = arith.cmpi slt, %0, %1 : vector<8x16x16xi32>
    %3 = arith.extui %2 : vector<8x16x16xi1> to vector<8x16x16xi32>
    %4 = arith.sitofp %3 : vector<8x16x16xi32> to vector<8x16x16xf32>
    %cst = arith.constant 0.000000e+00 : f32
    %5 = vector.broadcast %cst : f32 to vector<8x16x1xf32>
    %6 = vector.extract_strided_slice %4 {offsets = [0, 0, 1], sizes = [8, 16, 15], strides = [1, 1, 1]} : vector<8x16x16xf32> to vector<8x16x15xf32>
    %7 = tpu.concatenate %6, %5 in 2 : vector<8x16x15xf32>, vector<8x16x1xf32> -> vector<8x16x16xf32>
    %8 = arith.maximumf %4, %7 : vector<8x16x16xf32>
    %cst_2 = arith.constant 0.000000e+00 : f32
    %9 = vector.broadcast %cst_2 : f32 to vector<8x16x1xf32>
    %10 = vector.extract_strided_slice %4 {offsets = [0, 0, 0], sizes = [8, 16, 15], strides = [1, 1, 1]} : vector<8x16x16xf32> to vector<8x16x15xf32>
    %11 = tpu.concatenate %9, %10 in 2 : vector<8x16x1xf32>, vector<8x16x15xf32> -> vector<8x16x16xf32>
    %12 = arith.maximumf %8, %11 : vector<8x16x16xf32>
    %cst_3 = arith.constant 0.000000e+00 : f32
    %13 = vector.broadcast %cst_3 : f32 to vector<8x16x2xf32>
    %14 = vector.extract_strided_slice %4 {offsets = [0, 0, 2], sizes = [8, 16, 14], strides = [1, 1, 1]} : vector<8x16x16xf32> to vector<8x16x14xf32>
    %15 = tpu.concatenate %14, %13 in 2 : vector<8x16x14xf32>, vector<8x16x2xf32> -> vector<8x16x16xf32>
    %16 = arith.maximumf %12, %15 : vector<8x16x16xf32>
    %cst_4 = arith.constant 0.000000e+00 : f32
    %17 = vector.broadcast %cst_4 : f32 to vector<8x16x2xf32>
    %18 = vector.extract_strided_slice %4 {offsets = [0, 0, 0], sizes = [8, 16, 14], strides = [1, 1, 1]} : vector<8x16x16xf32> to vector<8x16x14xf32>
    %19 = tpu.concatenate %17, %18 in 2 : vector<8x16x2xf32>, vector<8x16x14xf32> -> vector<8x16x16xf32>
    %20 = arith.maximumf %16, %19 : vector<8x16x16xf32>
    %cst_5 = arith.constant 0.000000e+00 : f32
    %21 = vector.broadcast %cst_5 : f32 to vector<8x16x3xf32>
    %22 = vector.extract_strided_slice %4 {offsets = [0, 0, 3], sizes = [8, 16, 13], strides = [1, 1, 1]} : vector<8x16x16xf32> to vector<8x16x13xf32>
    %23 = tpu.concatenate %22, %21 in 2 : vector<8x16x13xf32>, vector<8x16x3xf32> -> vector<8x16x16xf32>
    %24 = arith.maximumf %20, %23 : vector<8x16x16xf32>
    %cst_6 = arith.constant 0.000000e+00 : f32
    %25 = vector.broadcast %cst_6 : f32 to vector<8x16x3xf32>
    %26 = vector.extract_strided_slice %4 {offsets = [0, 0, 0], sizes = [8, 16, 13], strides = [1, 1, 1]} : vector<8x16x16xf32> to vector<8x16x13xf32>
    %27 = tpu.concatenate %25, %26 in 2 : vector<8x16x3xf32>, vector<8x16x13xf32> -> vector<8x16x16xf32>
    %28 = arith.maximumf %24, %27 : vector<8x16x16xf32>
    %cst_7 = arith.constant 0.000000e+00 : f32
    %29 = vector.broadcast %cst_7 : f32 to vector<8x1x16xf32>
    %30 = vector.extract_strided_slice %28 {offsets = [0, 1, 0], sizes = [8, 15, 16], strides = [1, 1, 1]} : vector<8x16x16xf32> to vector<8x15x16xf32>
    %31 = tpu.concatenate %30, %29 in 1 : vector<8x15x16xf32>, vector<8x1x16xf32> -> vector<8x16x16xf32>
    %32 = arith.maximumf %28, %31 : vector<8x16x16xf32>
    %cst_8 = arith.constant 0.000000e+00 : f32
    %33 = vector.broadcast %cst_8 : f32 to vector<8x1x16xf32>
    %34 = vector.extract_strided_slice %28 {offsets = [0, 0, 0], sizes = [8, 15, 16], strides = [1, 1, 1]} : vector<8x16x16xf32> to vector<8x15x16xf32>
    %35 = tpu.concatenate %33, %34 in 1 : vector<8x1x16xf32>, vector<8x15x16xf32> -> vector<8x16x16xf32>
    %36 = arith.maximumf %32, %35 : vector<8x16x16xf32>
    %cst_9 = arith.constant 0.000000e+00 : f32
    %37 = vector.broadcast %cst_9 : f32 to vector<8x2x16xf32>
    %38 = vector.extract_strided_slice %28 {offsets = [0, 2, 0], sizes = [8, 14, 16], strides = [1, 1, 1]} : vector<8x16x16xf32> to vector<8x14x16xf32>
    %39 = tpu.concatenate %38, %37 in 1 : vector<8x14x16xf32>, vector<8x2x16xf32> -> vector<8x16x16xf32>
    %40 = arith.maximumf %36, %39 : vector<8x16x16xf32>
    %cst_10 = arith.constant 0.000000e+00 : f32
    %41 = vector.broadcast %cst_10 : f32 to vector<8x2x16xf32>
    %42 = vector.extract_strided_slice %28 {offsets = [0, 0, 0], sizes = [8, 14, 16], strides = [1, 1, 1]} : vector<8x16x16xf32> to vector<8x14x16xf32>
    %43 = tpu.concatenate %41, %42 in 1 : vector<8x2x16xf32>, vector<8x14x16xf32> -> vector<8x16x16xf32>
    %44 = arith.maximumf %40, %43 : vector<8x16x16xf32>
    %cst_11 = arith.constant 0.000000e+00 : f32
    %45 = vector.broadcast %cst_11 : f32 to vector<8x3x16xf32>
    %46 = vector.extract_strided_slice %28 {offsets = [0, 3, 0], sizes = [8, 13, 16], strides = [1, 1, 1]} : vector<8x16x16xf32> to vector<8x13x16xf32>
    %47 = tpu.concatenate %46, %45 in 1 : vector<8x13x16xf32>, vector<8x3x16xf32> -> vector<8x16x16xf32>
    %48 = arith.maximumf %44, %47 : vector<8x16x16xf32>
    %cst_12 = arith.constant 0.000000e+00 : f32
    %49 = vector.broadcast %cst_12 : f32 to vector<8x3x16xf32>
    %50 = vector.extract_strided_slice %28 {offsets = [0, 0, 0], sizes = [8, 13, 16], strides = [1, 1, 1]} : vector<8x16x16xf32> to vector<8x13x16xf32>
    %51 = tpu.concatenate %49, %50 in 1 : vector<8x3x16xf32>, vector<8x13x16xf32> -> vector<8x16x16xf32>
    %52 = arith.maximumf %48, %51 : vector<8x16x16xf32>
    %cst_13 = arith.constant 1.000000e+00 : f32
    %53 = vector.broadcast %cst_13 : f32 to vector<8x16x16xf32>
    %54 = arith.subf %53, %52 : vector<8x16x16xf32>
    %55 = arith.fptosi %54 : vector<8x16x16xf32> to vector<8x16x16xi8>
    %c0_14 = arith.constant 0 : index
    %c0_15 = arith.constant 0 : index
    %c0_16 = arith.constant 0 : index
    %56 = vector.load %arg2[%c0_14, %c0_15, %c0_16] : memref<8x16x16xi8, #tpu.memory_space<vmem>>, vector<8x16x16xi8>
    tpu.vector_store %arg2[%c0_14, %c0_15, %c0_16], %55 {strides = array<i32>} : memref<8x16x16xi8, #tpu.memory_space<vmem>>, vector<8x16x16xi8>,
    %57 = vector.shape_cast %54 : vector<8x16x16xf32> to vector<1x8x16x16xf32>
    %cst_17 = arith.constant dense<0.000000e+00> : vector<1xf32>
    %58 = vector.multi_reduction <add>, %57, %cst_17 [1, 2, 3] : vector<1x8x16x16xf32> to vector<1xf32>
    %59 = vector.shape_cast %58 : vector<1xf32> to vector<1x1x1x1xf32>
    %60 = vector.extract %59[0, 0, 0, 0] : f32 from vector<1x1x1x1xf32>
    %61 = vector.broadcast %60 : f32 to vector<1x8x128xf32>
    %c0_18 = arith.constant 0 : index
    %c0_19 = arith.constant 0 : index
    %c0_20 = arith.constant 0 : index
    %62 = vector.load %arg3[%c0_18, %c0_19, %c0_20] : memref<1x8x128xf32, #tpu.memory_space<vmem>>, vector<1x8x128xf32>
    tpu.vector_store %arg3[%c0_18, %c0_19, %c0_20], %61 {strides = array<i32>} : memref<1x8x128xf32, #tpu.memory_space<vmem>>, vector<1x8x128xf32>,
    return
  }
  func.func @transform_0(%arg0: i32) -> (i32, i32, i32) {
    %c0_i32 = arith.constant 0 : i32
    %c0_i32_0 = arith.constant 0 : i32
    %c0_i32_1 = arith.constant 0 : i32
    return %arg0, %c0_i32, %c0_i32_0 : i32, i32, i32
  }
  func.func @transform_1(%arg0: i32) -> (i32, i32, i32) {
    %c0_i32 = arith.constant 0 : i32
    %c0_i32_0 = arith.constant 0 : i32
    %c0_i32_1 = arith.constant 0 : i32
    return %arg0, %c0_i32, %c0_i32_0 : i32, i32, i32
  }
  func.func @transform_2(%arg0: i32) -> (i32, i32, i32) {
    %c0_i32 = arith.constant 0 : i32
    %c0_i32_0 = arith.constant 0 : i32
    %c0_i32_1 = arith.constant 0 : i32
    return %arg0, %c0_i32, %c0_i32_0 : i32, i32, i32
  }
}

</mosaic_0001>

<bundles_post_ra>
// kernel: tpu_custom_call.1
= control target key start
LH: loop header
LB: loop body
LE: loop exit
PB: predicated region body
PF: predicated region fallthrough
CT: control target
= control target key end

     0   :  { %8 = vsyncpa [#allocation3], 0  ;;  %s2532_s0 = inlined_call_operand.hbm [shape: s32[8,16,16], index: 0, kind: input, shape index: {}]   ;;  %s2533_s1 = inlined_call_operand.hbm [shape: s8[8,16,16], index: 1, kind: output, shape index: {0}]   ;;  %s2534_s2 = inlined_call_operand.hbm [shape: f32[1,8,128], index: 2, kind: output, shape index: {1}]  }
   0x1   :  { %9 = vsyncpa [#allocation4], 0 }
   0x2   :  { %10 = vsyncpa [#allocation7], 0  ;;  %s1560_s9 = smov [#allocation2]   ;;  %s1488_s13 = scalar_lea.hbm %s2532_s0, 2048 }
   0x3   :  { %s16_s10 = sshll.u32 %s1560_s9, 4  ;;  %p1489_p0 = scmp.ne.s32.totalorder %s2532_s0, %s1488_s13  ;;  %s17_s10 = int_to_ptr.vmem [resolvable:$true] %s16_s10 }
   0x4   :  { %p1492_p1 = scmp.lt.u32.totalorder %s1488_s13, %s2532_s0 }
   0x6   :  { %p1494_p2 = pnand %p1492_p1, %p1489_p0 }
   0x8   :  { %1497 = shalt.err (!%p1494_p2)
}
   0x9   :  { %s1498_s18 = scalar_lea.vmem %s17_s10, 2048  ;;  %p1503_p4 = scmp.lt.s32.totalorder %s17_s10, %s17_s10 }
   0xa   :  { %p1499_p3 = scmp.ne.s32.totalorder %s17_s10, %s1498_s18  ;;  %p1504_p5 = scmp.lt.s32.totalorder %s1498_s18, %s1498_s18 }
   0xc   :  { %p1505_p6 = por %p1504_p5, %p1503_p4 }
   0xe   :  { %p1506_p7 = pnand %p1505_p6, %p1499_p3 }
  0x10   :  { %1509 = shalt.err (!%p1506_p7)
}
  0x11   :  { %s1561_s19 = smov 128   ;;  %s1562_s20 = smov 8  }
  0x12   :  { %22 = dma.hbm_to_vmem [thread:$0]  %s2532_s0, 2048, %s17_s10, [#allocation3], %s1561_s19, %s1561_s19, %s1562_s20  }
  0x13   :  { %1554 = dma.done.wait [#allocation3], 2048  }
  0x14   :  { %1555 = vsyncadd [#allocation3], 4294965248  ;;  %v26_v0 = vld [vmem:[#allocation2] sm:$0xff]  ;;  %v27_v1 = vld [vmem:[#allocation2 + $0x8] sm:$0xff]  ;;  %v1563_v5 = vmov 0.0   ;;  %s1564_s0 = smov 1  }
  0x15   :  { %v28_v2 = vld [vmem:[#allocation2 + $0x10] sm:$0xff]  ;;  %vm42_vm0 = vcmp.lt.s32.totalorder %v26_v0, 2169922661  ;;  %vm43_vm1 = vcmp.lt.s32.totalorder %v27_v1, 2169922661  ;;  %v29_v3 = vld [vmem:[#allocation2 + $0x18] sm:$0xff] }
  0x16   :  { %v30_v4 = vld [vmem:[#allocation2 + $0x20] sm:$0xff]  ;;  %v1601_v6 = vsel %vm42_vm0, 1.0, %v1563_v5  ;;  %v1604_v7 = vsel %vm43_vm1, 1.0, %v1563_v5  ;;  %vm44_vm2 = vcmp.lt.s32.totalorder %v28_v2, 2169922661  ;;  %v31_v11 = vld [vmem:[#allocation2 + $0x28] sm:$0xff] }
  0x17   :  { %vm45_vm3 = vcmp.lt.s32.totalorder %v29_v3, 2169922661  ;;  %v1258_v8 = vpack.i.bf16 %v1604_v7, %v1601_v6  ;;  %v1609_v9 = vsel %vm44_vm2, 1.0, %v1563_v5  ;;  %vm46_vm4 = vcmp.lt.s32.totalorder %v30_v4, 2169922661  ;;  %s1565_s23 = smov 127  }
  0x18   :  { %v1612_v10 = vsel %vm45_vm3, 1.0, %v1563_v5  ;;  %vm47_vm5 = vcmp.lt.s32.totalorder %v31_v11, 2169922661  ;;  %v1619_v13 = vsel %vm46_vm4, 1.0, %v1563_v5  ;;  %v32_v16 = vld [vmem:[#allocation2 + $0x30] sm:$0xff]  ;;  %v33_v17 = vld [vmem:[#allocation2 + $0x38] sm:$0xff] }
  0x19   :  { %1259 = vrot.lane.b32.xlu1 %v1258_v8, %s1564_s0  ;;  %1249 = vrot.lane.b32.xlu0 %v1258_v8, %s1565_s23  ;;  %v1263_v12 = vpack.i.bf16 %v1612_v10, %v1609_v9  ;;  %v1622_v14 = vsel %vm47_vm5, 1.0, %v1563_v5  ;;  %s1566_s24 = smov 126   ;;  %vm48_vm6 = vcmp.lt.s32.totalorder %v32_v16, 2169922661  ;;  %vm49_vm7 = vcmp.lt.s32.totalorder %v33_v17, 2169922661 }
  0x1a   :  { %v1273_v15 = vpack.i.bf16 %v1622_v14, %v1619_v13  ;;  %s1567_s25 = smov 2   ;;  %v1633_v18 = vsel %vm48_vm6, 1.0, %v1563_v5  ;;  %v1636_v19 = vsel %vm49_vm7, 1.0, %v1563_v5  ;;  %s1568_s26 = smov 125   ;;  %v34_v21 = vld [vmem:[#allocation2 + $0x40] sm:$0xff]  ;;  %v35_v22 = vld [vmem:[#allocation2 + $0x48] sm:$0xff] }
  0x1b   :  { %v1303_v20 = vpack.i.bf16 %v1636_v19, %v1633_v18  ;;  %vm50_vm8 = vcmp.lt.s32.totalorder %v34_v21, 2169922661  ;;  %vm51_vm9 = vcmp.lt.s32.totalorder %v35_v22, 2169922661  ;;  %s1569_s27 = smov 3   ;;  %v36_v26 = vld [vmem:[#allocation2 + $0x50] sm:$0xff] }
  0x1c   :  { %v1649_v23 = vsel %vm50_vm8, 1.0, %v1563_v5  ;;  %v1652_v24 = vsel %vm51_vm9, 1.0, %v1563_v5  ;;  %v37_v27 = vld [vmem:[#allocation2 + $0x58] sm:$0xff]  ;;  %vm52_vm10 = vcmp.lt.s32.totalorder %v36_v26, 2169922661  ;;  %v38_v31 = vld [vmem:[#allocation2 + $0x60] sm:$0xff] }
  0x1d   :  { %1264 = vrot.lane.b32.xlu1 %v1263_v12, %s1564_s0  ;;  %1254 = vrot.lane.b32.xlu0 %v1263_v12, %s1565_s23  ;;  %v1338_v25 = vpack.i.bf16 %v1652_v24, %v1649_v23  ;;  %vm53_vm11 = vcmp.lt.s32.totalorder %v37_v27, 2169922661  ;;  %v1663_v28 = vsel %vm52_vm10, 1.0, %v1563_v5  ;;  %v39_v32 = vld [vmem:[#allocation2 + $0x68] sm:$0xff]  ;;  %vm54_vm12 = vcmp.lt.s32.totalorder %v38_v31, 2169922661 }
  0x1e   :  { %v1666_v29 = vsel %vm53_vm11, 1.0, %v1563_v5  ;;  %vm55_vm13 = vcmp.lt.s32.totalorder %v39_v32, 2169922661  ;;  %v1677_v33 = vsel %vm54_vm12, 1.0, %v1563_v5  ;;  %v40_v36 = vld [vmem:[#allocation2 + $0x70] sm:$0xff]  ;;  %v41_v37 = vld [vmem:[#allocation2 + $0x78] sm:$0xff] }
  0x1f   :  { %v1368_v30 = vpack.i.bf16 %v1666_v29, %v1663_v28  ;;  %v1680_v34 = vsel %vm55_vm13, 1.0, %v1563_v5  ;;  %vm56_vm14 = vcmp.lt.s32.totalorder %v40_v36, 2169922661  ;;  %vm57_vm15 = vcmp.lt.s32.totalorder %v41_v37, 2169922661  ;;  %s1570_s28 = smov [#allocation5]  }
  0x20   :  { %v1398_v35 = vpack.i.bf16 %v1680_v34, %v1677_v33  ;;  %v1691_v38 = vsel %vm56_vm14, 1.0, %v1563_v5  ;;  %v1694_v39 = vsel %vm57_vm15, 1.0, %v1563_v5  ;;  %vm235_vm0 = vcmask 7168   ;;  %s1191_s29 = sshll.u32 %s1570_s28, 4  ;;  %s1192_s29 = int_to_ptr.vmem [resolvable:$true] %s1191_s29 }
  0x21   :  { %1274 = vrot.lane.b32.xlu1 %v1273_v15, %s1565_s23  ;;  %1269 = vrot.lane.b32.xlu0 %v1258_v8, %s1566_s24  ;;  %v1428_v40 = vpack.i.bf16 %v1694_v39, %v1691_v38  ;;  %vm154_vm1 = vcmask 121856   ;;  %vm316_vm2 = vcmask 113664   ;;  %vm397_vm3 = vcmask 15360   ;;  %s1510_s30 = scalar_lea.vmem %s1192_s29, 512  ;;  %p1515_p9 = scmp.lt.s32.totalorder %s1192_s29, %s1192_s29 }
  0x22   :  { %vm478_vm4 = vcmask 105472   ;;  %vm559_vm5 = vcmask 23552   ;;  %vm608_vm6 = vcmask 1046528   ;;  %vm673_vm7 = vcmask 1040384   ;;  %p1511_p8 = scmp.ne.s32.totalorder %s1192_s29, %s1510_s30  ;;  %p1516_p10 = scmp.lt.s32.totalorder %s1510_s30, %s1510_s30 }
  0x23   :  { %vm738_vm8 = vcmask 1045504   ;;  %vm803_vm9 = vcmask 1041408   ;;  %vm868_vm10 = vcmask 1044480   ;;  %vm933_vm11 = vcmask 1042432  }
  0x24   :  { %vm1143_vm12 = vcmask 130048   ;;  %vm1126_vm13 = vcmask 123904   ;;  %p1517_p11 = por %p1516_p10, %p1515_p9 }
  0x25   :  { %1284 = vrot.lane.b32.xlu1 %v1258_v8, %s1567_s25  ;;  %1279 = vrot.lane.b32.xlu0 %v1263_v12, %s1566_s24 }
  0x26   :  { %p1518_p12 = pnand %p1517_p11, %p1511_p8 }
  0x29   :  { %1294 = vrot.lane.b32.xlu1 %v1263_v12, %s1567_s25  ;;  %1289 = vrot.lane.b32.xlu0 %v1273_v15, %s1564_s0 }
  0x2d   :  { %1304 = vrot.lane.b32.xlu1 %v1303_v20, %s1565_s23  ;;  %1299 = vrot.lane.b32.xlu0 %v1258_v8, %s1568_s26 }
  0x31   :  { %1314 = vrot.lane.b32.xlu1 %v1263_v12, %s1568_s26  ;;  %1309 = vrot.lane.b32.xlu0 %v1273_v15, %s1566_s24 }
  0x35   :  { %1324 = vrot.lane.b32.xlu1 %v1303_v20, %s1564_s0  ;;  %1319 = vrot.lane.b32.xlu0 %v1258_v8, %s1569_s27 }
  0x39   :  { %1334 = vrot.lane.b32.xlu1 %v1263_v12, %s1569_s27  ;;  %1329 = vrot.lane.b32.xlu0 %v1273_v15, %s1567_s25 }
  0x3d   :  { %1344 = vrot.lane.b32.xlu1 %v1303_v20, %s1566_s24  ;;  %1339 = vrot.lane.b32.xlu0 %v1338_v25, %s1565_s23 }
  0x41   :  { %1354 = vrot.lane.b32.xlu1 %v1338_v25, %s1564_s0  ;;  %1349 = vrot.lane.b32.xlu0 %v1273_v15, %s1568_s26 }
  0x45   :  { %1364 = vrot.lane.b32.xlu1 %v1273_v15, %s1569_s27  ;;  %1359 = vrot.lane.b32.xlu0 %v1303_v20, %s1567_s25 }
  0x49   :  { %1374 = vrot.lane.b32.xlu1 %v1338_v25, %s1566_s24  ;;  %1369 = vrot.lane.b32.xlu0 %v1368_v30, %s1565_s23 }
  0x4d   :  { %1384 = vrot.lane.b32.xlu1 %v1368_v30, %s1564_s0  ;;  %1379 = vrot.lane.b32.xlu0 %v1303_v20, %s1568_s26 }
  0x51   :  { %1394 = vrot.lane.b32.xlu1 %v1303_v20, %s1569_s27  ;;  %1389 = vrot.lane.b32.xlu0 %v1338_v25, %s1567_s25 }
  0x55   :  { %1404 = vrot.lane.b32.xlu1 %v1368_v30, %s1566_s24  ;;  %1399 = vrot.lane.b32.xlu0 %v1398_v35, %s1565_s23 }
  0x59   :  { %1414 = vrot.lane.b32.xlu1 %v1398_v35, %s1564_s0  ;;  %1409 = vrot.lane.b32.xlu0 %v1338_v25, %s1568_s26 }
  0x5d   :  { %1424 = vrot.lane.b32.xlu1 %v1338_v25, %s1569_s27  ;;  %1419 = vrot.lane.b32.xlu0 %v1368_v30, %s1567_s25 }
  0x61   :  { %1434 = vrot.lane.b32.xlu1 %v1398_v35, %s1566_s24  ;;  %1429 = vrot.lane.b32.xlu0 %v1428_v40, %s1565_s23 }
  0x65   :  { %1444 = vrot.lane.b32.xlu1 %v1428_v40, %s1564_s0  ;;  %1439 = vrot.lane.b32.xlu0 %v1368_v30, %s1568_s26 }
  0x69   :  { %1454 = vrot.lane.b32.xlu1 %v1368_v30, %s1569_s27  ;;  %1449 = vrot.lane.b32.xlu0 %v1398_v35, %s1567_s25 }
  0x6d   :  { %1464 = vrot.lane.b32.xlu1 %v1398_v35, %s1568_s26  ;;  %1459 = vrot.lane.b32.xlu0 %v1428_v40, %s1566_s24 }
  0x71   :  { %1474 = vrot.lane.b32.xlu1 %v1398_v35, %s1569_s27  ;;  %1469 = vrot.lane.b32.xlu0 %v1428_v40, %s1567_s25 }
  0x75   :  { %1479 = vrot.lane.b32.xlu0 %v1428_v40, %s1568_s26  ;;  %1484 = vrot.lane.b32.xlu1 %v1428_v40, %s1569_s27 }
  0x8b   :  { %v1260_v41 = vpop.permute.xlu1 %1259  ;;  %v1250_v42 = vpop.permute.xlu0 %1249 }
  0x8c   :  { %v1262_v43 = vunpack.i.h.bf16 %v1260_v41  ;;  %v1261_v44 = vunpack.i.l.bf16 %v1260_v41  ;;  %v1252_v45 = vunpack.i.h.bf16 %v1250_v42  ;;  %v1251_v46 = vunpack.i.l.bf16 %v1250_v42 }
  0x8e   :  { %v237_v47 = vsel %vm235_vm0, 0.0, %v1262_v43  ;;  %v236_v48 = vsel %vm235_vm0, 0.0, %v1261_v44  ;;  %v156_v49 = vsel %vm154_vm1, %v1252_v45, 0.0  ;;  %v155_v50 = vsel %vm154_vm1, %v1251_v46, 0.0 }
  0x8f   :  { %v172_v51 = vmax.f32 %v1604_v7, %v156_v49  ;;  %v171_v52 = vmax.f32 %v1601_v6, %v155_v50  ;;  %v1265_v53 = vpop.permute.xlu1 %1264  ;;  %v1255_v54 = vpop.permute.xlu0 %1254 }
  0x90   :  { %v1267_v55 = vunpack.i.h.bf16 %v1265_v53  ;;  %v1266_v56 = vunpack.i.l.bf16 %v1265_v53  ;;  %v1257_v57 = vunpack.i.h.bf16 %v1255_v54  ;;  %v1256_v58 = vunpack.i.l.bf16 %v1255_v54 }
  0x91   :  { %v252_v59 = vmax.f32 %v171_v52, %v236_v48  ;;  %v253_v60 = vmax.f32 %v172_v51, %v237_v47 }
  0x92   :  { %v239_v61 = vsel %vm235_vm0, 0.0, %v1267_v55  ;;  %v238_v62 = vsel %vm235_vm0, 0.0, %v1266_v56  ;;  %v158_v63 = vsel %vm154_vm1, %v1257_v57, 0.0  ;;  %v157_v0 = vsel %vm154_vm1, %v1256_v58, 0.0 }
  0x93   :  { %v174_v1 = vmax.f32 %v1612_v10, %v158_v63  ;;  %v173_v2 = vmax.f32 %v1609_v9, %v157_v0  ;;  %v1275_v3 = vpop.permute.xlu1 %1274  ;;  %v1270_v4 = vpop.permute.xlu0 %1269 }
  0x94   :  { %v1272_v5 = vunpack.i.h.bf16 %v1270_v4  ;;  %v1271_v6 = vunpack.i.l.bf16 %v1270_v4  ;;  %v1277_v7 = vunpack.i.h.bf16 %v1275_v3  ;;  %v1276_v8 = vunpack.i.l.bf16 %v1275_v3 }
  0x95   :  { %v254_v11 = vmax.f32 %v173_v2, %v238_v62  ;;  %v255_v12 = vmax.f32 %v174_v1, %v239_v61 }
  0x96   :  { %v318_v15 = vsel %vm316_vm2, %v1272_v5, 0.0  ;;  %v317_v16 = vsel %vm316_vm2, %v1271_v6, 0.0  ;;  %v160_v27 = vsel %vm154_vm1, %v1277_v7, 0.0  ;;  %v159_v30 = vsel %vm154_vm1, %v1276_v8, 0.0 }
  0x97   :  { %v333_v17 = vmax.f32 %v252_v59, %v317_v16  ;;  %v334_v20 = vmax.f32 %v253_v60, %v318_v15  ;;  %v1285_v21 = vpop.permute.xlu1 %1284  ;;  %v1280_v10 = vpop.permute.xlu0 %1279  ;;  %v176_v49 = vmax.f32 %v1622_v14, %v160_v27  ;;  %v175_v50 = vmax.f32 %v1619_v13, %v159_v30 }
  0x98   :  { %v1287_v22 = vunpack.i.h.bf16 %v1285_v21  ;;  %v1286_v9 = vunpack.i.l.bf16 %v1285_v21  ;;  %v1282_v25 = vunpack.i.h.bf16 %v1280_v10  ;;  %v1281_v26 = vunpack.i.l.bf16 %v1280_v10 }
  0x9a   :  { %v399_v31 = vsel %vm397_vm3, 0.0, %v1287_v22  ;;  %v398_v32 = vsel %vm397_vm3, 0.0, %v1286_v9  ;;  %v320_v35 = vsel %vm316_vm2, %v1282_v25, 0.0  ;;  %v319_v36 = vsel %vm316_vm2, %v1281_v26, 0.0 }
  0x9b   :  { %v1732_v37 = vmax.f32 %v333_v17, %v398_v32  ;;  %v1734_v40 = vmax.f32 %v334_v20, %v399_v31  ;;  %v335_v41 = vmax.f32 %v254_v11, %v319_v36  ;;  %v336_v42 = vmax.f32 %v255_v12, %v320_v35  ;;  %v1295_v43 = vpop.permute.xlu1 %1294  ;;  %v1290_v44 = vpop.permute.xlu0 %1289 }
  0x9c   :  { %v1297_v45 = vunpack.i.h.bf16 %v1295_v43  ;;  %v1296_v46 = vunpack.i.l.bf16 %v1295_v43  ;;  %v1292_v47 = vunpack.i.h.bf16 %v1290_v44  ;;  %v1291_v48 = vunpack.i.l.bf16 %v1290_v44 }
  0x9e   :  { %v401_v51 = vsel %vm397_vm3, 0.0, %v1297_v45  ;;  %v400_v52 = vsel %vm397_vm3, 0.0, %v1296_v46  ;;  %v241_v53 = vsel %vm235_vm0, 0.0, %v1292_v47  ;;  %v240_v54 = vsel %vm235_vm0, 0.0, %v1291_v48 }
  0x9f   :  { %v1742_v55 = vmax.f32 %v335_v41, %v400_v52  ;;  %v1744_v56 = vmax.f32 %v336_v42, %v401_v51  ;;  %v1746_v57 = vmax.f32 %v176_v49, %v241_v53  ;;  %v1748_v58 = vmax.f32 %v175_v50, %v240_v54  ;;  %v1305_v14 = vpop.permute.xlu1 %1304  ;;  %v1300_v59 = vpop.permute.xlu0 %1299 }
  0xa0   :  { %v1307_v13 = vunpack.i.h.bf16 %v1305_v14  ;;  %v1306_v60 = vunpack.i.l.bf16 %v1305_v14  ;;  %v1302_v61 = vunpack.i.h.bf16 %v1300_v59  ;;  %v1301_v62 = vunpack.i.l.bf16 %v1300_v59 }
  0xa2   :  { %v480_v63 = vsel %vm478_vm4, %v1302_v61, 0.0  ;;  %v479_v0 = vsel %vm478_vm4, %v1301_v62, 0.0  ;;  %v162_v1 = vsel %vm154_vm1, %v1307_v13, 0.0  ;;  %v161_v2 = vsel %vm154_vm1, %v1306_v60, 0.0 }
  0xa3   :  { %v495_v3 = vmax.f32 %v1732_v37, %v479_v0  ;;  %v496_v4 = vmax.f32 %v1734_v40, %v480_v63  ;;  %v1315_v5 = vpop.permute.xlu1 %1314  ;;  %v1310_v6 = vpop.permute.xlu0 %1309  ;;  %v178_v21 = vmax.f32 %v1636_v19, %v162_v1  ;;  %v177_v10 = vmax.f32 %v1633_v18, %v161_v2 }
  0xa4   :  { %v1317_v7 = vunpack.i.h.bf16 %v1315_v5  ;;  %v1316_v8 = vunpack.i.l.bf16 %v1315_v5  ;;  %v1312_v11 = vunpack.i.h.bf16 %v1310_v6  ;;  %v1311_v12 = vunpack.i.l.bf16 %v1310_v6 }
  0xa6   :  { %v1757_v15 = vsel %vm478_vm4, %v1317_v7, 0.0  ;;  %v1760_v16 = vsel %vm478_vm4, %v1316_v8, 0.0  ;;  %v1763_v17 = vsel %vm316_vm2, %v1312_v11, 0.0  ;;  %v1766_v20 = vsel %vm316_vm2, %v1311_v12, 0.0 }
  0xa7   :  { %v1325_v22 = vpop.permute.xlu1 %1324  ;;  %v1320_v9 = vpop.permute.xlu0 %1319  ;;  %v497_v31 = vmax.f32 %v1742_v55, %v1760_v16  ;;  %v498_v32 = vmax.f32 %v1744_v56, %v1757_v15  ;;  %v337_v19 = vmax.f32 %v1748_v58, %v1766_v20  ;;  %v338_v18 = vmax.f32 %v1746_v57, %v1763_v17 }
  0xa8   :  { %v1327_v25 = vunpack.i.h.bf16 %v1325_v22  ;;  %v1326_v26 = vunpack.i.l.bf16 %v1325_v22  ;;  %v1322_v27 = vunpack.i.h.bf16 %v1320_v9  ;;  %v1321_v30 = vunpack.i.l.bf16 %v1320_v9 }
  0xaa   :  { %v243_v35 = vsel %vm235_vm0, 0.0, %v1327_v25  ;;  %v242_v36 = vsel %vm235_vm0, 0.0, %v1326_v26  ;;  %v561_v37 = vsel %vm559_vm5, 0.0, %v1322_v27  ;;  %v560_v40 = vsel %vm559_vm5, 0.0, %v1321_v30 }
  0xab   :  { %v1782_v41 = vmax.f32 %v177_v10, %v242_v36  ;;  %v1784_v42 = vmax.f32 %v178_v21, %v243_v35  ;;  %v576_v43 = vmax.f32 %v495_v3, %v560_v40  ;;  %v577_v44 = vmax.f32 %v496_v4, %v561_v37  ;;  %v1335_v45 = vpop.permute.xlu1 %1334  ;;  %v1330_v46 = vpop.permute.xlu0 %1329 }
  0xac   :  { %v1337_v47 = vunpack.i.h.bf16 %v1335_v45  ;;  %v1336_v48 = vunpack.i.l.bf16 %v1335_v45  ;;  %v1332_v49 = vunpack.i.h.bf16 %v1330_v46  ;;  %v1331_v50 = vunpack.i.l.bf16 %v1330_v46 }
  0xad   :  { %v609_v51 = vrot.slane %v576_v43, 1  ;;  %v610_v52 = vrot.slane %v577_v44, 1  ;;  %v674_v53 = vrot.slane %v576_v43, 7  ;;  %v675_v54 = vrot.slane %v577_v44, 7 }
  0xae   :  { %v739_v55 = vrot.slane %v576_v43, 2  ;;  %v740_v56 = vrot.slane %v577_v44, 2  ;;  %v804_v57 = vrot.slane %v576_v43, 6  ;;  %v805_v58 = vrot.slane %v577_v44, 6 }
  0xaf   :  { %v611_v14 = vsel %vm608_vm6, %v609_v51, %v610_v52  ;;  %v649_v59 = vsel %vm608_vm6, %v610_v52, 0.0  ;;  %v676_v13 = vsel %vm673_vm7, %v674_v53, %v675_v54  ;;  %v714_v60 = vsel %vm673_vm7, 0.0, %v674_v53  ;;  %v1790_v61 = vpop.permute.xlu1 %1344  ;;  %v1792_v62 = vpop.permute.xlu0 %1339 }
  0xb0   :  { %v657_v63 = vmax.f32 %v576_v43, %v611_v14  ;;  %v658_v0 = vmax.f32 %v577_v44, %v649_v59  ;;  %v741_v1 = vsel %vm738_vm8, %v739_v55, %v740_v56  ;;  %v779_v2 = vsel %vm738_vm8, %v740_v56, 0.0 }
  0xb1   :  { %v806_v3 = vsel %vm803_vm9, %v804_v57, %v805_v58  ;;  %v844_v4 = vsel %vm803_vm9, 0.0, %v804_v57  ;;  %v869_v5 = vrot.slane %v576_v43, 3  ;;  %v870_v6 = vrot.slane %v577_v44, 3 }
  0xb2   :  { %v722_v7 = vmax.f32 %v657_v63, %v714_v60  ;;  %v723_v8 = vmax.f32 %v658_v0, %v676_v13  ;;  %v934_v11 = vrot.slane %v576_v43, 5  ;;  %v935_v12 = vrot.slane %v577_v44, 5 }
  0xb3   :  { %v871_v15 = vsel %vm868_vm10, %v869_v5, %v870_v6  ;;  %v1800_v16 = vsel %vm868_vm10, %v870_v6, 0.0  ;;  %v563_v17 = vsel %vm559_vm5, 0.0, %v1337_v47  ;;  %v562_v20 = vsel %vm559_vm5, 0.0, %v1336_v48  ;;  %v1804_v21 = vpop.permute.xlu1 %1354  ;;  %v1806_v10 = vpop.permute.xlu0 %1349 }
  0xb4   :  { %v787_v22 = vmax.f32 %v722_v7, %v741_v1  ;;  %v788_v9 = vmax.f32 %v723_v8, %v779_v2  ;;  %v1809_v25 = vsel %vm933_vm11, %v934_v11, %v935_v12  ;;  %v974_v26 = vsel %vm933_vm11, 0.0, %v934_v11 }
  0xb5   :  { %v1812_v27 = vmax.f32 %v497_v31, %v562_v20  ;;  %v1814_v30 = vmax.f32 %v498_v32, %v563_v17  ;;  %v403_v35 = vsel %vm397_vm3, 0.0, %v1332_v49  ;;  %v402_v36 = vsel %vm397_vm3, 0.0, %v1331_v50 }
  0xb6   :  { %v852_v37 = vmax.f32 %v787_v22, %v844_v4  ;;  %v1818_v40 = vmax.f32 %v788_v9, %v806_v3  ;;  %v1820_v43 = vmax.f32 %v337_v19, %v402_v36  ;;  %v1822_v44 = vmax.f32 %v338_v18, %v403_v35 }
  0xb7   :  { %v612_v45 = vrot.slane %v1812_v27, 1  ;;  %v613_v46 = vrot.slane %v1814_v30, 1  ;;  %v677_v31 = vrot.slane %v1812_v27, 7  ;;  %v678_v32 = vrot.slane %v1814_v30, 7  ;;  %v1828_v47 = vpop.permute.xlu1 %1364  ;;  %v1830_v48 = vpop.permute.xlu0 %1359 }
  0xb8   :  { %v917_v49 = vmax.f32 %v852_v37, %v871_v15  ;;  %v742_v19 = vrot.slane %v1812_v27, 2  ;;  %v743_v18 = vrot.slane %v1814_v30, 2  ;;  %v807_v59 = vrot.slane %v1812_v27, 6 }
  0xb9   :  { %v614_v51 = vsel %vm608_vm6, %v612_v45, %v613_v46  ;;  %v650_v52 = vsel %vm608_vm6, %v613_v46, 0.0  ;;  %v679_v53 = vsel %vm673_vm7, %v677_v31, %v678_v32  ;;  %v715_v54 = vsel %vm673_vm7, 0.0, %v677_v31 }
  0xba   :  { %v1840_v55 = vmax.f32 %v917_v49, %v974_v26  ;;  %v659_v56 = vmax.f32 %v1812_v27, %v614_v51  ;;  %v660_v57 = vmax.f32 %v1814_v30, %v650_v52  ;;  %v744_v58 = vsel %vm738_vm8, %v742_v19, %v743_v18 }
  0xbb   :  { %v1846_v14 = vsel %vm738_vm8, %v743_v18, 0.0  ;;  %v808_v13 = vrot.slane %v1814_v30, 6  ;;  %v872_v60 = vrot.slane %v1812_v27, 3  ;;  %v1851_v63 = vpop.permute.xlu1 %1374  ;;  %v1853_v0 = vpop.permute.xlu0 %1369  ;;  %v873_v3 = vrot.slane %v1814_v30, 3 }
  0xbc   :  { %2541 = vst [vmem:[#allocation11_spill] sm:$0xff] %v1840_v55  ;;  %v724_v1 = vmax.f32 %v659_v56, %v715_v54  ;;  %v1855_v2 = vmax.f32 %v660_v57, %v679_v53  ;;  %v2535_v4 = vrot.slane %v1812_v27, 5  ;;  %v845_v6 = vsel %vm803_vm9, 0.0, %v807_v59 }
  0xbd   :  { %v1860_v5 = vsel %vm803_vm9, %v807_v59, %v808_v13  ;;  %v1347_v8 = vunpack.i.h.bf16 %v1790_v61  ;;  %v1868_v15 = vsel %vm868_vm10, %v872_v60, %v873_v3  ;;  %v1871_v17 = vsel %vm868_vm10, %v873_v3, 0.0 }
  0xbe   :  { %v789_v11 = vmax.f32 %v724_v1, %v744_v58  ;;  %v1876_v20 = vsel %vm933_vm11, 0.0, %v2535_v4  ;;  %v1346_v9 = vunpack.i.l.bf16 %v1790_v61  ;;  %v1342_v26 = vunpack.i.h.bf16 %v1792_v62 }
  0xbf   :  { %v324_v22 = vsel %vm316_vm2, %v1347_v8, 0.0  ;;  %v1881_v35 = vpop.permute.xlu1 %1384  ;;  %v1883_v36 = vpop.permute.xlu0 %1379  ;;  %v1341_v46 = vunpack.i.l.bf16 %v1792_v62  ;;  %v1357_v31 = vunpack.i.h.bf16 %v1804_v21  ;;  %v1356_v61 = vunpack.i.l.bf16 %v1804_v21 }
  0xc0   :  { %v1885_v37 = vmax.f32 %v789_v11, %v845_v6  ;;  %v340_v45 = vmax.f32 %v1784_v42, %v324_v22  ;;  %v323_v32 = vsel %vm316_vm2, %v1346_v9, 0.0  ;;  %v164_v49 = vsel %vm154_vm1, %v1342_v26, 0.0 }
  0xc1   :  { %v1352_v19 = vunpack.i.h.bf16 %v1806_v10  ;;  %v339_v18 = vmax.f32 %v1782_v41, %v323_v32  ;;  %v180_v51 = vmax.f32 %v1652_v24, %v164_v49  ;;  %v163_v52 = vsel %vm154_vm1, %v1341_v46, 0.0 }
  0xc2   :  { %v245_v42 = vsel %vm235_vm0, 0.0, %v1357_v31  ;;  %v179_v62 = vmax.f32 %v1649_v23, %v163_v52  ;;  %v244_v53 = vsel %vm235_vm0, 0.0, %v1356_v61  ;;  %v1351_v56 = vunpack.i.l.bf16 %v1806_v10 }
  0xc3   :  { %v484_v54 = vsel %vm478_vm4, %v1352_v19, 0.0  ;;  %v1902_v57 = vpop.permute.xlu1 %1394  ;;  %v1904_v21 = vpop.permute.xlu0 %1389  ;;  %v1906_v58 = vmax.f32 %v180_v51, %v245_v42  ;;  %v1367_v41 = vunpack.i.h.bf16 %v1828_v47  ;;  %v1366_v59 = vunpack.i.l.bf16 %v1828_v47 }
  0xc4   :  { %v500_v24 = vmax.f32 %v1822_v44, %v484_v54  ;;  %v1911_v13 = vmax.f32 %v179_v62, %v244_v53  ;;  %v483_v23 = vsel %vm478_vm4, %v1351_v56, 0.0  ;;  %v1362_v60 = vunpack.i.h.bf16 %v1830_v48 }
  0xc5   :  { %v1361_v10 = vunpack.i.l.bf16 %v1830_v48  ;;  %v499_v1 = vmax.f32 %v1820_v43, %v483_v23  ;;  %v565_v3 = vsel %vm559_vm5, 0.0, %v1367_v41  ;;  %v564_v6 = vsel %vm559_vm5, 0.0, %v1366_v59 }
  0xc6   :  { %v1377_v44 = vunpack.i.h.bf16 %v1851_v63  ;;  %v1920_v8 = vmax.f32 %v500_v24, %v565_v3  ;;  %v405_v47 = vsel %vm397_vm3, 0.0, %v1362_v60  ;;  %v1376_v22 = vunpack.i.l.bf16 %v1851_v63 }
  0xc7   :  { %v404_v11 = vsel %vm397_vm3, 0.0, %v1361_v10  ;;  %v1925_v9 = vpop.permute.xlu1 %1404  ;;  %v1927_v26 = vpop.permute.xlu0 %1399  ;;  %v1929_v48 = vmax.f32 %v499_v1, %v564_v6  ;;  %v1931_v43 = vmax.f32 %v340_v45, %v405_v47 }
  0xc8   :  { %v420_v46 = vmax.f32 %v339_v18, %v404_v11  ;;  %v1934_v31 = vsel %vm316_vm2, %v1377_v44, 0.0  ;;  %v616_v32 = vrot.slane %v1920_v8, 1  ;;  %v681_v49 = vrot.slane %v1920_v8, 7 }
  0xc9   :  { %v746_v61 = vrot.slane %v1920_v8, 2  ;;  %v615_v19 = vrot.slane %v1929_v48, 1  ;;  %v680_v51 = vrot.slane %v1929_v48, 7  ;;  %v745_v52 = vrot.slane %v1929_v48, 2 }
  0xca   :  { %v2536_v45 = vrot.slane %v1929_v48, 6  ;;  %v651_v18 = vsel %vm608_vm6, %v616_v32, 0.0  ;;  %v325_v47 = vsel %vm316_vm2, %v1376_v22, 0.0  ;;  %v342_v11 = vmax.f32 %v1906_v58, %v1934_v31 }
  0xcb   :  { %v1946_v42 = vsel %vm738_vm8, %v746_v61, 0.0  ;;  %v1950_v54 = vpop.permute.xlu1 %1414  ;;  %v1952_v56 = vpop.permute.xlu0 %1409  ;;  %v617_v24 = vsel %vm608_vm6, %v615_v19, %v616_v32  ;;  %v662_v41 = vmax.f32 %v1920_v8, %v651_v18  ;;  %v682_v59 = vsel %vm673_vm7, %v680_v51, %v681_v49 }
  0xcc   :  { %v716_v23 = vsel %vm673_vm7, 0.0, %v680_v51  ;;  %v661_v60 = vmax.f32 %v1929_v48, %v617_v24  ;;  %v1960_v10 = vsel %vm738_vm8, %v745_v52, %v746_v61  ;;  %v1965_v1 = vsel %vm803_vm9, 0.0, %v2536_v45 }
  0xcd   :  { %v1968_v6 = vmax.f32 %v662_v41, %v682_v59  ;;  %v341_v49 = vmax.f32 %v1911_v13, %v325_v47  ;;  %v1372_v61 = vunpack.i.h.bf16 %v1853_v0  ;;  %v1371_v19 = vunpack.i.l.bf16 %v1853_v0 }
  0xce   :  { %v1974_v32 = vmax.f32 %v661_v60, %v716_v23  ;;  %v1387_v18 = vunpack.i.h.bf16 %v1881_v35  ;;  %v1386_v24 = vunpack.i.l.bf16 %v1881_v35  ;;  %v1382_v22 = vunpack.i.h.bf16 %v1883_v36 }
  0xcf   :  { %v1979_v51 = vpop.permute.xlu1 %1424  ;;  %v1981_v52 = vpop.permute.xlu0 %1419  ;;  %v1381_v58 = vunpack.i.l.bf16 %v1883_v36  ;;  %v166_v31 = vsel %vm154_vm1, %v1372_v61, 0.0  ;;  %v165_v13 = vsel %vm154_vm1, %v1371_v19, 0.0  ;;  %v1397_v41 = vunpack.i.h.bf16 %v1902_v57 }
  0xd0   :  { %v1396_v0 = vunpack.i.l.bf16 %v1902_v57  ;;  %v182_v59 = vmax.f32 %v1666_v29, %v166_v31  ;;  %v181_v23 = vmax.f32 %v1663_v28, %v165_v13  ;;  %v247_v60 = vsel %vm235_vm0, 0.0, %v1387_v18 }
  0xd1   :  { %v246_v35 = vsel %vm235_vm0, 0.0, %v1386_v24  ;;  %v486_v47 = vsel %vm478_vm4, %v1382_v22, 0.0  ;;  %v485_v36 = vsel %vm478_vm4, %v1381_v58, 0.0  ;;  %v567_v61 = vsel %vm559_vm5, 0.0, %v1397_v41 }
  0xd2   :  { %v566_v19 = vsel %vm559_vm5, 0.0, %v1396_v0  ;;  %v2001_v3 = vmax.f32 %v181_v23, %v246_v35  ;;  %v2003_v57 = vmax.f32 %v182_v59, %v247_v60  ;;  %v501_v29 = vmax.f32 %v420_v46, %v485_v36 }
  0xd3   :  { %v1999_v50 = vpop.permute.xlu0 %1429  ;;  %v502_v28 = vmax.f32 %v1931_v43, %v486_v47  ;;  %v1392_v18 = vunpack.i.h.bf16 %v1904_v21  ;;  %v1391_v24 = vunpack.i.l.bf16 %v1904_v21  ;;  %v1407_v22 = vunpack.i.h.bf16 %v1925_v9  ;;  %v2010_v31 = vpop.permute.xlu1 %1434 }
  0xd4   :  { %v1406_v58 = vunpack.i.l.bf16 %v1925_v9  ;;  %v2012_v13 = vmax.f32 %v501_v29, %v566_v19  ;;  %v1402_v0 = vunpack.i.h.bf16 %v1927_v26  ;;  %v1401_v46 = vunpack.i.l.bf16 %v1927_v26 }
  0xd5   :  { %v2014_v41 = vmax.f32 %v502_v28, %v567_v61  ;;  %v407_v43 = vsel %vm397_vm3, 0.0, %v1392_v18  ;;  %v406_v59 = vsel %vm397_vm3, 0.0, %v1391_v24  ;;  %v328_v21 = vsel %vm316_vm2, %v1407_v22, 0.0 }
  0xd6   :  { %v327_v23 = vsel %vm316_vm2, %v1406_v58, 0.0  ;;  %v618_v9 = vrot.slane %v2012_v13, 1  ;;  %v683_v47 = vrot.slane %v2012_v13, 7  ;;  %v422_v4 = vmax.f32 %v341_v49, %v406_v59 }
  0xd7   :  { %v2022_v60 = vpop.permute.xlu0 %1439  ;;  %v619_v35 = vrot.slane %v2014_v41, 1  ;;  %v684_v36 = vrot.slane %v2014_v41, 7  ;;  %v423_v7 = vmax.f32 %v342_v11, %v407_v43  ;;  %v343_v62 = vmax.f32 %v2001_v3, %v327_v23 }
  0xd8   :  { %v2041_v24 = vsel %vm673_vm7, 0.0, %v683_v47  ;;  %v168_v53 = vsel %vm154_vm1, %v1402_v0, 0.0  ;;  %v167_v12 = vsel %vm154_vm1, %v1401_v46, 0.0  ;;  %v1417_v29 = vunpack.i.h.bf16 %v1950_v54 }
  0xd9   :  { %v2033_v28 = vsel %vm608_vm6, %v618_v9, %v619_v35  ;;  %v2036_v18 = vsel %vm608_vm6, %v619_v35, 0.0  ;;  %v1445_v9 = vpop.permute.xlu1 %1444  ;;  %v344_v35 = vmax.f32 %v2003_v57, %v328_v21  ;;  %v184_v19 = vmax.f32 %v1680_v34, %v168_v53 }
  0xda   :  { %v663_v58 = vmax.f32 %v2012_v13, %v2033_v28  ;;  %v183_v22 = vmax.f32 %v1677_v33, %v167_v12  ;;  %v1416_v45 = vunpack.i.l.bf16 %v1950_v54  ;;  %v1412_v11 = vunpack.i.h.bf16 %v1952_v56 }
  0xdb   :  { %v2056_v63 = vpop.permute.xlu0 %1449  ;;  %v1411_v3 = vunpack.i.l.bf16 %v1952_v56  ;;  %v1427_v49 = vunpack.i.h.bf16 %v1979_v51  ;;  %v1426_v57 = vunpack.i.l.bf16 %v1979_v51  ;;  %v249_v0 = vsel %vm235_vm0, 0.0, %v1417_v29 }
  0xdc   :  { %v248_v34 = vsel %vm235_vm0, 0.0, %v1416_v45  ;;  %v1422_v33 = vunpack.i.h.bf16 %v1981_v52  ;;  %v1421_v12 = vunpack.i.l.bf16 %v1981_v52  ;;  %v265_v54 = vmax.f32 %v184_v19, %v249_v0 }
  0xdd   :  { %v2066_v53 = vmax.f32 %v183_v22, %v248_v34  ;;  %v488_v46 = vsel %vm478_vm4, %v1412_v11, 0.0  ;;  %v487_v43 = vsel %vm478_vm4, %v1411_v3, 0.0  ;;  %v569_v21 = vsel %vm559_vm5, 0.0, %v1427_v49  ;;  %v1455_v23 = vpop.permute.xlu1 %1454 }
  0xde   :  { %v503_v56 = vmax.f32 %v422_v4, %v487_v43  ;;  %v504_v59 = vmax.f32 %v423_v7, %v488_v46  ;;  %v568_v51 = vsel %vm559_vm5, 0.0, %v1426_v57  ;;  %v409_v45 = vsel %vm397_vm3, 0.0, %v1422_v33 }
  0xdf   :  { %v408_v29 = vsel %vm397_vm3, 0.0, %v1421_v12  ;;  %v1437_v52 = vunpack.i.h.bf16 %v2010_v31  ;;  %v1436_v22 = vunpack.i.l.bf16 %v2010_v31  ;;  %v425_v4 = vmax.f32 %v344_v35, %v409_v45  ;;  %v1460_v7 = vpop.permute.xlu0 %1459 }
  0xe0   :  { %v2076_v19 = vmax.f32 %v503_v56, %v568_v51  ;;  %v2078_v11 = vmax.f32 %v504_v59, %v569_v21  ;;  %v424_v3 = vmax.f32 %v343_v62, %v408_v29  ;;  %v1432_v0 = vunpack.i.h.bf16 %v1999_v50 }
  0xe1   :  { %v330_v49 = vsel %vm316_vm2, %v1437_v52, 0.0  ;;  %v329_v57 = vsel %vm316_vm2, %v1436_v22, 0.0  ;;  %v1431_v34 = vunpack.i.l.bf16 %v1999_v50  ;;  %v1447_v50 = vunpack.i.h.bf16 %v1445_v9  ;;  %v1465_v45 = vpop.permute.xlu1 %1464 }
  0xe2   :  { %v621_v33 = vrot.slane %v2076_v19, 1  ;;  %v622_v12 = vrot.slane %v2078_v11, 1  ;;  %v686_v31 = vrot.slane %v2076_v19, 7  ;;  %v687_v46 = vrot.slane %v2078_v11, 7 }
  0xe3   :  { %v345_v35 = vmax.f32 %v2066_v53, %v329_v57  ;;  %v346_v43 = vmax.f32 %v265_v54, %v330_v49  ;;  %v170_v56 = vsel %vm154_vm1, %v1432_v0, 0.0  ;;  %v169_v21 = vsel %vm154_vm1, %v1431_v34, 0.0 }
  0xe4   :  { %v186_v59 = vmax.f32 %v1694_v39, %v170_v56  ;;  %v1446_v51 = vunpack.i.l.bf16 %v1445_v9  ;;  %v185_v29 = vmax.f32 %v1691_v38, %v169_v21  ;;  %v1442_v52 = vunpack.i.h.bf16 %v2022_v60  ;;  %v1470_v39 = vpop.permute.xlu0 %1469 }
  0xe5   :  { %v1441_v22 = vunpack.i.l.bf16 %v2022_v60  ;;  %v1457_v26 = vunpack.i.h.bf16 %v1455_v23  ;;  %v251_v62 = vsel %vm235_vm0, 0.0, %v1447_v50  ;;  %v1456_v54 = vunpack.i.l.bf16 %v1455_v23 }
  0xe6   :  { %v250_v53 = vsel %vm235_vm0, 0.0, %v1446_v51  ;;  %v1452_v49 = vunpack.i.h.bf16 %v2056_v63  ;;  %v267_v0 = vmax.f32 %v186_v59, %v251_v62  ;;  %v490_v9 = vsel %vm478_vm4, %v1442_v52, 0.0  ;;  %v1475_v52 = vpop.permute.xlu1 %1474 }
  0xe7   :  { %v266_v57 = vmax.f32 %v185_v29, %v250_v53  ;;  %v489_v34 = vsel %vm478_vm4, %v1441_v22, 0.0  ;;  %v506_v56 = vmax.f32 %v425_v4, %v490_v9  ;;  %v571_v21 = vsel %vm559_vm5, 0.0, %v1457_v26 }
  0xe8   :  { %v505_v38 = vmax.f32 %v424_v3, %v489_v34  ;;  %v570_v60 = vsel %vm559_vm5, 0.0, %v1456_v54  ;;  %v411_v50 = vsel %vm397_vm3, 0.0, %v1452_v49  ;;  %v1451_v51 = vunpack.i.l.bf16 %v2056_v63  ;;  %v1480_v49 = vpop.permute.xlu0 %1479 }
  0xe9   :  { %v1467_v23 = vunpack.i.h.bf16 %v1465_v45  ;;  %v1466_v61 = vunpack.i.l.bf16 %v1465_v45  ;;  %v2107_v29 = vmax.f32 %v506_v56, %v571_v21  ;;  %v427_v62 = vmax.f32 %v346_v43, %v411_v50 }
  0xea   :  { %v2105_v44 = vmax.f32 %v505_v38, %v570_v60  ;;  %v1462_v59 = vunpack.i.h.bf16 %v1460_v7  ;;  %v410_v3 = vsel %vm397_vm3, 0.0, %v1451_v51  ;;  %v1461_v22 = vunpack.i.l.bf16 %v1460_v7 }
  0xeb   :  { %v492_v4 = vsel %vm478_vm4, %v1467_v23, 0.0  ;;  %v491_v26 = vsel %vm478_vm4, %v1466_v61, 0.0  ;;  %v426_v54 = vmax.f32 %v345_v35, %v410_v3  ;;  %v1477_v43 = vunpack.i.h.bf16 %v1475_v52  ;;  %v1485_v35 = vpop.permute.xlu1 %1484 }
  0xec   :  { %v624_v53 = vrot.slane %v2105_v44, 1  ;;  %v508_v63 = vmax.f32 %v427_v62, %v492_v4  ;;  %v332_v45 = vsel %vm316_vm2, %v1462_v59, 0.0  ;;  %v331_v9 = vsel %vm316_vm2, %v1461_v22, 0.0 }
  0xed   :  { %v348_v34 = vmax.f32 %v267_v0, %v332_v45  ;;  %v1476_v38 = vunpack.i.l.bf16 %v1475_v52  ;;  %v507_v56 = vmax.f32 %v426_v54, %v491_v26  ;;  %v347_v21 = vmax.f32 %v266_v57, %v331_v9 }
  0xee   :  { %v1472_v60 = vunpack.i.h.bf16 %v1470_v39  ;;  %v1471_v50 = vunpack.i.l.bf16 %v1470_v39  ;;  %v573_v51 = vsel %vm559_vm5, 0.0, %v1477_v43  ;;  %v1482_v7 = vunpack.i.h.bf16 %v1480_v49 }
  0xef   :  { %v572_v61 = vsel %vm559_vm5, 0.0, %v1476_v38  ;;  %v1481_v23 = vunpack.i.l.bf16 %v1480_v49  ;;  %v2119_v59 = vmax.f32 %v508_v63, %v573_v51  ;;  %v1487_v26 = vunpack.i.h.bf16 %v1485_v35 }
  0xf0   :  { %v2117_v62 = vmax.f32 %v507_v56, %v572_v61  ;;  %v413_v3 = vsel %vm397_vm3, 0.0, %v1472_v60  ;;  %v412_v0 = vsel %vm397_vm3, 0.0, %v1471_v50  ;;  %v494_v57 = vsel %vm478_vm4, %v1482_v7, 0.0 }
  0xf1   :  { %v428_v52 = vmax.f32 %v347_v21, %v412_v0  ;;  %v429_v4 = vmax.f32 %v348_v34, %v413_v3  ;;  %v493_v39 = vsel %vm478_vm4, %v1481_v23, 0.0  ;;  %v1486_v22 = vunpack.i.l.bf16 %v1485_v35 }
  0xf2   :  { %v623_v54 = vsel %vm608_vm6, %v621_v33, %v622_v12  ;;  %v625_v63 = vrot.slane %v2107_v29, 1  ;;  %v627_v9 = vrot.slane %v2117_v62, 1  ;;  %v628_v34 = vrot.slane %v2119_v59, 1 }
  0xf3   :  { %v509_v45 = vmax.f32 %v428_v52, %v493_v39  ;;  %v510_v49 = vmax.f32 %v429_v4, %v494_v57  ;;  %v575_v43 = vsel %vm559_vm5, 0.0, %v1487_v26  ;;  %v574_v38 = vsel %vm559_vm5, 0.0, %v1486_v22 }
  0xf4   :  { %v626_v56 = vsel %vm608_vm6, %v624_v53, %v625_v63  ;;  %v653_v21 = vsel %vm608_vm6, %v622_v12, 0.0  ;;  %v629_v50 = vsel %vm608_vm6, %v627_v9, %v628_v34  ;;  %v654_v51 = vsel %vm608_vm6, %v625_v63, 0.0 }
  0xf5   :  { %v2139_v60 = vmax.f32 %v509_v45, %v574_v38  ;;  %v2141_v33 = vmax.f32 %v510_v49, %v575_v43  ;;  %v655_v61 = vsel %vm608_vm6, %v628_v34, 0.0  ;;  %v665_v7 = vmax.f32 %v2076_v19, %v623_v54 }
  0xf6   :  { %v666_v23 = vmax.f32 %v2078_v11, %v653_v21  ;;  %v667_v53 = vmax.f32 %v2105_v44, %v626_v56  ;;  %v668_v3 = vmax.f32 %v2107_v29, %v654_v51  ;;  %v669_v0 = vmax.f32 %v2117_v62, %v629_v50 }
  0xf7   :  { %v630_v35 = vrot.slane %v2139_v60, 1  ;;  %v631_v12 = vrot.slane %v2141_v33, 1  ;;  %v670_v52 = vmax.f32 %v2119_v59, %v655_v61  ;;  %v685_v4 = vsel %vm673_vm7, %v683_v47, %v684_v36 }
  0xf8   :  { %v688_v57 = vsel %vm673_vm7, %v686_v31, %v687_v46  ;;  %v689_v39 = vrot.slane %v2105_v44, 7  ;;  %v690_v54 = vrot.slane %v2107_v29, 7  ;;  %v692_v63 = vrot.slane %v2117_v62, 7 }
  0xf9   :  { %v632_v26 = vsel %vm608_vm6, %v630_v35, %v631_v12  ;;  %v656_v22 = vsel %vm608_vm6, %v631_v12, 0.0  ;;  %v693_v36 = vrot.slane %v2119_v59, 7  ;;  %v695_v49 = vrot.slane %v2139_v60, 7 }
  0xfa   :  { %v671_v45 = vmax.f32 %v2139_v60, %v632_v26  ;;  %v672_v47 = vmax.f32 %v2141_v33, %v656_v22  ;;  %v691_v46 = vsel %vm673_vm7, %v689_v39, %v690_v54  ;;  %v696_v9 = vrot.slane %v2141_v33, 7 }
  0xfb   :  { %v718_v34 = vsel %vm673_vm7, 0.0, %v686_v31  ;;  %v719_v43 = vsel %vm673_vm7, 0.0, %v689_v39  ;;  %v694_v38 = vsel %vm673_vm7, %v692_v63, %v693_v36  ;;  %v720_v56 = vsel %vm673_vm7, 0.0, %v692_v63 }
  0xfc   :  { %v721_v21 = vsel %vm673_vm7, 0.0, %v695_v49  ;;  %v2186_v50 = vmax.f32 %v663_v58, %v2041_v24  ;;  %v697_v51 = vsel %vm673_vm7, %v695_v49, %v696_v9  ;;  %v2542_v61 = vmax.f32 %v2014_v41, %v2036_v18 }
  0xfd   :  { %v730_v35 = vmax.f32 %v665_v7, %v718_v34  ;;  %v731_v12 = vmax.f32 %v666_v23, %v688_v57  ;;  %v732_v39 = vmax.f32 %v667_v53, %v719_v43  ;;  %v733_v26 = vmax.f32 %v668_v3, %v691_v46 }
  0xfe   :  { %v729_v31 = vmax.f32 %v2542_v61, %v685_v4  ;;  %v734_v22 = vmax.f32 %v669_v0, %v720_v56  ;;  %v735_v54 = vmax.f32 %v670_v52, %v694_v38  ;;  %v736_v63 = vmax.f32 %v671_v45, %v721_v21 }
  0xff   :  { %v737_v36 = vmax.f32 %v672_v47, %v697_v51  ;;  %v2543_v55 = vrot.slane %v2014_v41, 2  ;;  %v2544_v28 = vrot.slane %v2012_v13, 2  ;;  %v752_v58 = vrot.slane %v2078_v11, 2 }
 0x100   :  { %v754_v49 = vrot.slane %v2105_v44, 2  ;;  %v755_v18 = vrot.slane %v2107_v29, 2  ;;  %v757_v7 = vrot.slane %v2117_v62, 2  ;;  %v758_v23 = vrot.slane %v2119_v59, 2 }
 0x101   :  { %v750_v24 = vsel %vm738_vm8, %v2544_v28, %v2543_v55  ;;  %v2545_v53 = vrot.slane %v2076_v19, 2  ;;  %v760_v0 = vrot.slane %v2139_v60, 2  ;;  %v761_v52 = vrot.slane %v2141_v33, 2 }
 0x102   :  { %v782_v4 = vsel %vm738_vm8, %v2543_v55, 0.0  ;;  %v756_v57 = vsel %vm738_vm8, %v754_v49, %v755_v18  ;;  %v759_v45 = vsel %vm738_vm8, %v757_v7, %v758_v23  ;;  %v783_v47 = vsel %vm738_vm8, %v752_v58, 0.0 }
 0x103   :  { %v753_v3 = vsel %vm738_vm8, %v2545_v53, %v752_v58  ;;  %v784_v46 = vsel %vm738_vm8, %v755_v18, 0.0  ;;  %v762_v9 = vsel %vm738_vm8, %v760_v0, %v761_v52  ;;  %v785_v34 = vsel %vm738_vm8, %v758_v23, 0.0 }
 0x104   :  { %v786_v43 = vsel %vm738_vm8, %v761_v52, 0.0  ;;  %v791_v38 = vmax.f32 %v1974_v32, %v1960_v10  ;;  %v792_v56 = vmax.f32 %v1968_v6, %v1946_v42  ;;  %v793_v21 = vmax.f32 %v2186_v50, %v750_v24 }
 0x105   :  { %v794_v51 = vmax.f32 %v729_v31, %v782_v4  ;;  %v795_v61 = vmax.f32 %v730_v35, %v753_v3  ;;  %v796_v28 = vmax.f32 %v731_v12, %v783_v47  ;;  %v797_v58 = vmax.f32 %v732_v39, %v756_v57 }
 0x106   :  { %v798_v49 = vmax.f32 %v733_v26, %v784_v46  ;;  %v799_v18 = vmax.f32 %v734_v22, %v759_v45  ;;  %v800_v7 = vmax.f32 %v735_v54, %v785_v34  ;;  %v801_v53 = vmax.f32 %v736_v63, %v762_v9 }
 0x107   :  { %v802_v0 = vmax.f32 %v737_v36, %v786_v43  ;;  %v2546_v23 = vrot.slane %v1920_v8, 6  ;;  %v2547_v52 = vrot.slane %v1929_v48, 6  ;;  %v2548_v32 = vrot.slane %v2014_v41, 6 }
 0x108   :  { %v2549_v42 = vrot.slane %v2012_v13, 6  ;;  %v816_v50 = vrot.slane %v2076_v19, 6  ;;  %v817_v31 = vrot.slane %v2078_v11, 6  ;;  %v819_v35 = vrot.slane %v2105_v44, 6 }
 0x109   :  { %v812_v10 = vsel %vm803_vm9, %v2547_v52, %v2546_v23  ;;  %v820_v12 = vrot.slane %v2107_v29, 6  ;;  %v822_v39 = vrot.slane %v2117_v62, 6  ;;  %v823_v26 = vrot.slane %v2119_v59, 6 }
 0x10a   :  { %v815_v6 = vsel %vm803_vm9, %v2549_v42, %v2548_v32  ;;  %v825_v22 = vrot.slane %v2139_v60, 6  ;;  %v818_v54 = vsel %vm803_vm9, %v816_v50, %v817_v31  ;;  %v826_v63 = vrot.slane %v2141_v33, 6 }
 0x10b   :  { %v2550_v36 = vmov %v2549_v42  ;;  %v848_v3 = vsel %vm803_vm9, 0.0, %v816_v50  ;;  %v821_v55 = vsel %vm803_vm9, %v819_v35, %v820_v12  ;;  %v824_v4 = vsel %vm803_vm9, %v822_v39, %v823_v26 }
 0x10c   :  { %v847_v24 = vsel %vm803_vm9, 0.0, %v2550_v36  ;;  %v849_v57 = vsel %vm803_vm9, 0.0, %v819_v35  ;;  %v850_v45 = vsel %vm803_vm9, 0.0, %v822_v39  ;;  %v827_v47 = vsel %vm803_vm9, %v825_v22, %v826_v63 }
 0x10d   :  { %v851_v46 = vsel %vm803_vm9, 0.0, %v825_v22  ;;  %v2551_v9 = vmax.f32 %v1855_v2, %v1846_v14  ;;  %v2258_v43 = vmax.f32 %v791_v38, %v1965_v1  ;;  %v2260_v23 = vmax.f32 %v792_v56, %v812_v10 }
 0x10e   :  { %v2262_v52 = vmax.f32 %v793_v21, %v847_v24  ;;  %v2264_v32 = vmax.f32 %v794_v51, %v815_v6  ;;  %v2266_v42 = vmax.f32 %v795_v61, %v848_v3  ;;  %v2268_v50 = vmax.f32 %v796_v28, %v818_v54 }
 0x10f   :  { %v2255_v34 = vmax.f32 %v2551_v9, %v1860_v5  ;;  %v2270_v31 = vmax.f32 %v797_v58, %v849_v57  ;;  %v2272_v35 = vmax.f32 %v798_v49, %v821_v55  ;;  %v2274_v14 = vmax.f32 %v799_v18, %v850_v45 }
 0x110   :  { %v2276_v2 = vmax.f32 %v800_v7, %v824_v4  ;;  %v2278_v5 = vmax.f32 %v801_v53, %v851_v46  ;;  %v2280_v1 = vmax.f32 %v802_v0, %v827_v47  ;;  %v2552_v38 = vrot.slane %v1920_v8, 3 }
 0x111   :  { %v2553_v56 = vrot.slane %v1929_v48, 3  ;;  %v879_v51 = vrot.slane %v2014_v41, 3  ;;  %v881_v61 = vrot.slane %v2076_v19, 3  ;;  %v882_v28 = vrot.slane %v2078_v11, 3 }
 0x112   :  { %v884_v58 = vrot.slane %v2105_v44, 3  ;;  %v885_v49 = vrot.slane %v2107_v29, 3  ;;  %v887_v18 = vrot.slane %v2117_v62, 3  ;;  %v888_v7 = vrot.slane %v2119_v59, 3 }
 0x113   :  { %v877_v21 = vsel %vm868_vm10, %v2553_v56, %v2552_v38  ;;  %v890_v53 = vrot.slane %v2139_v60, 3  ;;  %v2554_v0 = vrot.slane %v2012_v13, 3  ;;  %v883_v6 = vsel %vm868_vm10, %v881_v61, %v882_v28 }
 0x114   :  { %v891_v12 = vrot.slane %v2141_v33, 3  ;;  %v2555_v39 = vmov %v2552_v38  ;;  %v886_v22 = vsel %vm868_vm10, %v884_v58, %v885_v49  ;;  %v889_v54 = vsel %vm868_vm10, %v887_v18, %v888_v7 }
 0x115   :  { %v880_v10 = vsel %vm868_vm10, %v2554_v0, %v879_v51  ;;  %v911_v26 = vsel %vm868_vm10, %v2555_v39, 0.0  ;;  %v912_v63 = vsel %vm868_vm10, %v879_v51, 0.0  ;;  %v913_v36 = vsel %vm868_vm10, %v882_v28, 0.0 }
 0x116   :  { %v892_v24 = vsel %vm868_vm10, %v890_v53, %v891_v12  ;;  %v914_v3 = vsel %vm868_vm10, %v885_v49, 0.0  ;;  %v915_v55 = vsel %vm868_vm10, %v888_v7, 0.0  ;;  %v916_v4 = vsel %vm868_vm10, %v891_v12, 0.0 }
 0x117   :  { %v919_v57 = vmax.f32 %v1885_v37, %v1868_v15  ;;  %v920_v45 = vmax.f32 %v2255_v34, %v1871_v17  ;;  %v921_v47 = vmax.f32 %v2258_v43, %v877_v21  ;;  %v922_v46 = vmax.f32 %v2260_v23, %v911_v26 }
 0x118   :  { %v923_v9 = vmax.f32 %v2262_v52, %v880_v10  ;;  %v924_v38 = vmax.f32 %v2264_v32, %v912_v63  ;;  %v925_v56 = vmax.f32 %v2266_v42, %v883_v6  ;;  %v926_v51 = vmax.f32 %v2268_v50, %v913_v36  ;;  %v2562_v63 = vld [vmem:[#allocation11_spill] sm:$0xff] }
 0x119   :  { %v927_v61 = vmax.f32 %v2270_v31, %v886_v22  ;;  %v928_v28 = vmax.f32 %v2272_v35, %v914_v3  ;;  %v929_v15 = vmax.f32 %v2274_v14, %v889_v54  ;;  %v930_v17 = vmax.f32 %v2276_v2, %v915_v55 }
 0x11a   :  { %v931_v37 = vmax.f32 %v2278_v5, %v892_v24  ;;  %v932_v34 = vmax.f32 %v2280_v1, %v916_v4  ;;  %v2556_v43 = vrot.slane %v1814_v30, 5  ;;  %v2557_v23 = vrot.slane %v1812_v27, 5 }
 0x11b   :  { %v2558_v32 = vrot.slane %v1920_v8, 5  ;;  %v2559_v42 = vrot.slane %v1929_v48, 5  ;;  %v943_v31 = vrot.slane %v2012_v13, 5  ;;  %v944_v35 = vrot.slane %v2014_v41, 5 }
 0x11c   :  { %v939_v52 = vsel %vm933_vm11, %v2557_v23, %v2556_v43  ;;  %v946_v14 = vrot.slane %v2076_v19, 5  ;;  %v947_v2 = vrot.slane %v2078_v11, 5  ;;  %v949_v30 = vrot.slane %v2105_v44, 5 }
 0x11d   :  { %v942_v50 = vsel %vm933_vm11, %v2559_v42, %v2558_v32  ;;  %v950_v27 = vrot.slane %v2107_v29, 5  ;;  %v952_v5 = vrot.slane %v2117_v62, 5  ;;  %v953_v8 = vrot.slane %v2119_v59, 5 }
 0x11e   :  { %v945_v1 = vsel %vm933_vm11, %v943_v31, %v944_v35  ;;  %v948_v21 = vsel %vm933_vm11, %v946_v14, %v947_v2  ;;  %v955_v13 = vrot.slane %v2139_v60, 5  ;;  %v956_v41 = vrot.slane %v2141_v33, 5 }
 0x11f   :  { %v951_v19 = vsel %vm933_vm11, %v949_v30, %v950_v27  ;;  %v954_v11 = vsel %vm933_vm11, %v952_v5, %v953_v8  ;;  %v2560_v44 = vmov %v2559_v42  ;;  %v977_v62 = vsel %vm933_vm11, 0.0, %v943_v31 }
 0x120   :  { %v976_v29 = vsel %vm933_vm11, 0.0, %v2560_v44  ;;  %v957_v59 = vsel %vm933_vm11, %v955_v13, %v956_v41  ;;  %v978_v58 = vsel %vm933_vm11, 0.0, %v946_v14  ;;  %v979_v49 = vsel %vm933_vm11, 0.0, %v949_v30 }
 0x121   :  { %v980_v60 = vsel %vm933_vm11, 0.0, %v952_v5  ;;  %v981_v33 = vsel %vm933_vm11, 0.0, %v955_v13  ;;  %v2561_v18 = vmax.f32 %v1818_v40, %v1800_v16  ;;  %v2367_v48 = vmax.f32 %v919_v57, %v1876_v20 }
 0x122   :  { %v2369_v53 = vmax.f32 %v920_v45, %v939_v52  ;;  %v2371_v0 = vmax.f32 %v921_v47, %v976_v29  ;;  %v2373_v10 = vmax.f32 %v922_v46, %v942_v50  ;;  %v2375_v6 = vmax.f32 %v923_v9, %v977_v62 }
 0x123   :  { %v2364_v7 = vmax.f32 %v2561_v18, %v1809_v25  ;;  %v2377_v12 = vmax.f32 %v924_v38, %v945_v1  ;;  %v2379_v39 = vmax.f32 %v925_v56, %v978_v58  ;;  %v2381_v26 = vmax.f32 %v926_v51, %v948_v21 }
 0x124   :  { %v2383_v16 = vmax.f32 %v927_v61, %v979_v49  ;;  %v2385_v25 = vmax.f32 %v928_v28, %v951_v19  ;;  %v2387_v40 = vmax.f32 %v929_v15, %v980_v60  ;;  %v2389_v20 = vmax.f32 %v930_v17, %v954_v11 }
 0x125   :  { %v2391_v22 = vmax.f32 %v931_v37, %v981_v33  ;;  %v2393_v54 = vmax.f32 %v932_v34, %v957_v59  ;;  %v998_v36 = vsub.f32 1.0, %v2562_v63  ;;  %v1000_v24 = vsub.f32 1.0, %v2367_v48 }
 0x126   :  { %v1001_v3 = vsub.f32 1.0, %v2369_v53  ;;  %v1002_v55 = vsub.f32 1.0, %v2371_v0  ;;  %v1003_v4 = vsub.f32 1.0, %v2373_v10  ;;  %v1004_v57 = vsub.f32 1.0, %v2375_v6 }
 0x127   :  { %v1005_v45 = vsub.f32 1.0, %v2377_v12  ;;  %v1006_v47 = vsub.f32 1.0, %v2379_v39  ;;  %v1007_v46 = vsub.f32 1.0, %v2381_v26  ;;  %v1008_v9 = vsub.f32 1.0, %v2383_v16 }
 0x128   :  { %v1009_v38 = vsub.f32 1.0, %v2385_v25  ;;  %v1010_v56 = vsub.f32 1.0, %v2387_v40  ;;  %v2540_v51 = vsub.f32 1.0, %v2389_v20  ;;  %v2539_v61 = vsub.f32 1.0, %v2391_v22 }
 0x129   :  { %v2538_v28 = vsub.f32 1.0, %v2393_v54  ;;  %v999_v15 = vsub.f32 1.0, %v2364_v7  ;;  %v1016_v17 = vtrunc.f32 %v1000_v24  ;;  %v1017_v37 = vtrunc.f32 %v1001_v3 }
 0x12a   :  { %v1018_v34 = vtrunc.f32 %v1002_v55  ;;  %v1019_v43 = vtrunc.f32 %v1003_v4  ;;  %v1020_v23 = vtrunc.f32 %v1004_v57  ;;  %v1021_v52 = vtrunc.f32 %v1005_v45 }
 0x12b   :  { %v1022_v32 = vtrunc.f32 %v1006_v47  ;;  %v1023_v42 = vtrunc.f32 %v1007_v46  ;;  %v1024_v50 = vtrunc.f32 %v1008_v9  ;;  %v1025_v31 = vtrunc.f32 %v1009_v38 }
 0x12c   :  { %v1026_v35 = vtrunc.f32 %v1010_v56  ;;  %v1027_v14 = vtrunc.f32 %v2540_v51  ;;  %v1028_v2 = vtrunc.f32 %v2539_v61  ;;  %v1029_v30 = vtrunc.f32 %v2538_v28 }
 0x12d   :  { %v1036_v27 = vpack.c.f32.eXmY %v1016_v17, %v1017_v37, 312  ;;  %v1042_v5 = vpack.c.f32.eXmY %v1018_v34, %v1019_v43, 312  ;;  %v1144_v1 = vsel %vm1143_vm12, %v998_v36, 0.0  ;;  %v1145_v19 = vsel %vm1143_vm12, %v999_v15, 0.0 }
 0x12e   :  { %v1048_v8 = vpack.c.f32.eXmY %v1020_v23, %v1021_v52, 312  ;;  %v1054_v13 = vpack.c.f32.eXmY %v1022_v32, %v1023_v42, 312  ;;  %v1149_v48 = vsel %vm1143_vm12, %v1001_v3, 0.0  ;;  %v1014_v7 = vtrunc.f32 %v998_v36 }
 0x12f   :  { %v1040_v21 = vpack.c.b8 %v1036_v27, %v1036_v27  ;;  %v1060_v41 = vpack.c.f32.eXmY %v1024_v50, %v1025_v31, 312  ;;  %v1046_v11 = vpack.c.b8 %v1042_v5, %v1042_v5  ;;  %v1066_v29 = vpack.c.f32.eXmY %v1026_v35, %v1027_v14, 312 }
 0x130   :  { %v1052_v44 = vpack.c.b8 %v1048_v8, %v1048_v8  ;;  %v1072_v62 = vpack.c.f32.eXmY %v1028_v2, %v1029_v30, 312  ;;  %v1058_v59 = vpack.c.b8 %v1054_v13, %v1054_v13  ;;  %v1157_v0 = vsel %vm1143_vm12, %v1005_v45, 0.0 }
 0x131   :  { %v1064_v58 = vpack.c.b8 %v1060_v41, %v1060_v41  ;;  %v1080_v49 = vunpack.c.0.s8 %v1040_v21  ;;  %v1081_v60 = vunpack.c.1.s8 %v1040_v21  ;;  %v1070_v33 = vpack.c.b8 %v1066_v29, %v1066_v29 }
 0x132   :  { %v1076_v18 = vpack.c.b8 %v1072_v62, %v1072_v62  ;;  %v1082_v17 = vunpack.c.0.s8 %v1046_v11  ;;  %v1083_v37 = vunpack.c.1.s8 %v1046_v11  ;;  %v1084_v34 = vunpack.c.0.s8 %v1052_v44 }
 0x133   :  { %v1085_v43 = vunpack.c.1.s8 %v1052_v44  ;;  %v1086_v23 = vunpack.c.0.s8 %v1058_v59  ;;  %v1087_v52 = vunpack.c.1.s8 %v1058_v59  ;;  %v1088_v32 = vunpack.c.0.s8 %v1064_v58 }
 0x134   :  { %v1089_v42 = vunpack.c.1.s8 %v1064_v58  ;;  %v1090_v50 = vunpack.c.0.s8 %v1070_v33  ;;  %v1091_v31 = vunpack.c.1.s8 %v1070_v33  ;;  %v1092_v27 = vunpack.c.0.s8 %v1076_v18 }
 0x135   :  { %v1093_v35 = vunpack.c.1.s8 %v1076_v18  ;;  %v1098_v14 = vpack.c.b16 %v1080_v49, %v1080_v49  ;;  %v1100_v2 = vpack.c.b16 %v1081_v60, %v1081_v60  ;;  %v1102_v30 = vpack.c.b16 %v1082_v17, %v1082_v17 }
 0x136   :  { %v1104_v5 = vpack.c.b16 %v1083_v37, %v1083_v37  ;;  %v1106_v8 = vpack.c.b16 %v1084_v34, %v1084_v34  ;;  %v1108_v21 = vpack.c.b16 %v1085_v43, %v1085_v43  ;;  %v1110_v29 = vpack.c.b16 %v1086_v23, %v1086_v23 }
 0x137   :  { %v1099_v13 = vpack.c.b8 %v1098_v14, %v1098_v14  ;;  %v1101_v41 = vpack.c.b8 %v1100_v2, %v1100_v2  ;;  %v1112_v11 = vpack.c.b16 %v1087_v52, %v1087_v52  ;;  %v1103_v62 = vpack.c.b8 %v1102_v30, %v1102_v30 }
 0x138   :  { %v1105_v44 = vpack.c.b8 %v1104_v5, %v1104_v5  ;;  %v1107_v28 = vpack.c.b8 %v1106_v8, %v1106_v8  ;;  %v1109_v59 = vpack.c.b8 %v1108_v21, %v1108_v21  ;;  %v1111_v61 = vpack.c.b8 %v1110_v29, %v1110_v29 }
 0x139   :  { %v1113_v58 = vpack.c.b8 %v1112_v11, %v1112_v11  ;;  %v1114_v51 = vpack.c.b16 %v1088_v32, %v1088_v32  ;;  %v1116_v33 = vpack.c.b16 %v1089_v42, %v1089_v42  ;;  %1129 = vst.msk [vmem:[#allocation5 + $0x4] sm:$0x3] %vm1126_vm13, %v1099_v13  ;;  %1130 = vst.msk [vmem:[#allocation5 + $0x6] sm:$0x3] %vm1126_vm13, %v1101_v41  ;;  %v1147_v23 = vsel %vm1143_vm12, %v1000_v24, 0.0 }
 0x13a   :  { %v1118_v49 = vpack.c.b16 %v1090_v50, %v1090_v50  ;;  %v1120_v60 = vpack.c.b16 %v1091_v31, %v1091_v31  ;;  %v1122_v18 = vpack.c.b16 %v1092_v27, %v1092_v27  ;;  %v1124_v17 = vpack.c.b16 %v1093_v35, %v1093_v35  ;;  %1131 = vst.msk [vmem:[#allocation5 + $0x8] sm:$0x3] %vm1126_vm13, %v1103_v62 }
 0x13b   :  { %1132 = vst.msk [vmem:[#allocation5 + $0xa] sm:$0x3] %vm1126_vm13, %v1105_v44  ;;  %1133 = vst.msk [vmem:[#allocation5 + $0xc] sm:$0x3] %vm1126_vm13, %v1107_v28  ;;  %v1115_v37 = vpack.c.b8 %v1114_v51, %v1114_v51  ;;  %v1117_v34 = vpack.c.b8 %v1116_v33, %v1116_v33  ;;  %v1146_v43 = vadd.f32 %v1145_v19, %v1144_v1  ;;  %v1015_v51 = vtrunc.f32 %v999_v15 }
 0x13c   :  { %1134 = vst.msk [vmem:[#allocation5 + $0xe] sm:$0x3] %vm1126_vm13, %v1109_v59  ;;  %1135 = vst.msk [vmem:[#allocation5 + $0x10] sm:$0x3] %vm1126_vm13, %v1111_v61  ;;  %v1119_v52 = vpack.c.b8 %v1118_v49, %v1118_v49  ;;  %v1121_v32 = vpack.c.b8 %v1120_v60, %v1120_v60  ;;  %v1123_v42 = vpack.c.b8 %v1122_v18, %v1122_v18  ;;  %v1151_v24 = vsel %vm1143_vm12, %v1002_v55, 0.0 }
 0x13d   :  { %1136 = vst.msk [vmem:[#allocation5 + $0x12] sm:$0x3] %vm1126_vm13, %v1113_v58  ;;  %v1125_v50 = vpack.c.b8 %v1124_v17, %v1124_v17  ;;  %1137 = vst.msk [vmem:[#allocation5 + $0x14] sm:$0x3] %vm1126_vm13, %v1115_v37  ;;  %v1148_v28 = vadd.f32 %v1147_v23, %v1146_v43  ;;  %v1153_v1 = vsel %vm1143_vm12, %v1003_v4, 0.0  ;;  %v1155_v19 = vsel %vm1143_vm12, %v1004_v57, 0.0 }
 0x13e   :  { %1138 = vst.msk [vmem:[#allocation5 + $0x16] sm:$0x3] %vm1126_vm13, %v1117_v34  ;;  %1139 = vst.msk [vmem:[#allocation5 + $0x18] sm:$0x3] %vm1126_vm13, %v1119_v52  ;;  %v1030_v53 = vpack.c.f32.eXmY %v1014_v7, %v1015_v51, 312  ;;  %v1159_v63 = vsel %vm1143_vm12, %v1006_v47, 0.0 }
 0x13f   :  { %1140 = vst.msk [vmem:[#allocation5 + $0x1a] sm:$0x3] %vm1126_vm13, %v1121_v32  ;;  %1141 = vst.msk [vmem:[#allocation5 + $0x1c] sm:$0x3] %vm1126_vm13, %v1123_v42  ;;  %v1150_v61 = vadd.f32 %v1149_v48, %v1148_v28  ;;  %v1161_v57 = vsel %vm1143_vm12, %v1007_v46, 0.0  ;;  %v1163_v12 = vsel %vm1143_vm12, %v1008_v9, 0.0 }
 0x140   :  { %1142 = vst.msk [vmem:[#allocation5 + $0x1e] sm:$0x3] %vm1126_vm13, %v1125_v50  ;;  %v1034_v3 = vpack.c.b8 %v1030_v53, %v1030_v53  ;;  %v1165_v47 = vsel %vm1143_vm12, %v1009_v38, 0.0  ;;  %v1167_v26 = vsel %vm1143_vm12, %v1010_v56, 0.0  ;;  %v2563_v9 = vsub.f32 1.0, %v2389_v20 }
 0x141   :  { %v1152_v15 = vadd.f32 %v1151_v24, %v1150_v61  ;;  %v2564_v5 = vsub.f32 1.0, %v2391_v22  ;;  %v2565_v25 = vsub.f32 1.0, %v2393_v54 }
 0x142   :  { %v1078_v36 = vunpack.c.0.s8 %v1034_v3  ;;  %v1079_v10 = vunpack.c.1.s8 %v1034_v3  ;;  %v1169_v30 = vsel %vm1143_vm12, %v2563_v9, 0.0 }
 0x143   :  { %v1154_v31 = vadd.f32 %v1153_v1, %v1152_v15  ;;  %v1171_v8 = vsel %vm1143_vm12, %v2564_v5, 0.0  ;;  %v1173_v38 = vsel %vm1143_vm12, %v2565_v25, 0.0 }
 0x144   :  { %v1094_v4 = vpack.c.b16 %v1078_v36, %v1078_v36  ;;  %v1096_v35 = vpack.c.b16 %v1079_v10, %v1079_v10 }
 0x145   :  { %v1156_v27 = vadd.f32 %v1155_v19, %v1154_v31 }
 0x146   :  { %v1095_v14 = vpack.c.b8 %v1094_v4, %v1094_v4  ;;  %v1097_v45 = vpack.c.b8 %v1096_v35, %v1096_v35 }
 0x147   :  { %v1158_v55 = vadd.f32 %v1157_v0, %v1156_v27 }
 0x148   :  { %1127 = vst.msk [vmem:[#allocation5] sm:$0x3] %vm1126_vm13, %v1095_v14  ;;  %1128 = vst.msk [vmem:[#allocation5 + $0x2] sm:$0x3] %vm1126_vm13, %v1097_v45 }
 0x149   :  { %v1160_v6 = vadd.f32 %v1159_v63, %v1158_v55 }
 0x14b   :  { %v1162_v2 = vadd.f32 %v1161_v57, %v1160_v6 }
 0x14d   :  { %v1164_v39 = vadd.f32 %v1163_v12, %v1162_v2 }
 0x14f   :  { %v1166_v46 = vadd.f32 %v1165_v47, %v1164_v39 }
 0x151   :  { %v1168_v16 = vadd.f32 %v1167_v26, %v1166_v46 }
 0x153   :  { %v1170_v21 = vadd.f32 %v1169_v30, %v1168_v16 }
 0x155   :  { %v1172_v13 = vadd.f32 %v1171_v8, %v1170_v21 }
 0x157   :  { %v1174_v41 = vadd.f32 %v1173_v38, %v1172_v13 }
 0x159   :  { %1175 = vadd.xlane.f32.xlu0 %v1174_v41 }
 0x15a   :  { %1521 = shalt.err (!%p1518_p12)
}
 0x15b   :  { %s1522_s5 = scalar_lea.hbm %s2533_s1, 512 }
 0x15c   :  { %p1523_p13 = scmp.ne.s32.totalorder %s2533_s1, %s1522_s5  ;;  %p1526_p0 = scmp.lt.u32.totalorder %s1522_s5, %s2533_s1 }
 0x15e   :  { %p1528_p1 = pnand %p1526_p0, %p1523_p13 }
 0x160   :  { %1531 = shalt.err (!%p1528_p1)
}
 0x161   :  { %s1571_s10 = smov 32   ;;  %s1572_s13 = smov [#allocation6]  }
 0x162   :  { %1197 = dma.vmem_to_hbm [thread:$0]  %s1192_s29, 512, %s2533_s1, [#allocation4], %s1571_s10, %s1571_s10, %s1567_s25  }
 0x163   :  { %s1204_s14 = sshll.u32 %s1572_s13, 4  ;;  %s1205_s14 = int_to_ptr.vmem [resolvable:$true] %s1204_s14 }
 0x164   :  { %s1532_s16 = scalar_lea.vmem %s1205_s14, 128  ;;  %p1537_p3 = scmp.lt.s32.totalorder %s1205_s14, %s1205_s14 }
 0x165   :  { %p1533_p2 = scmp.ne.s32.totalorder %s1205_s14, %s1532_s16  ;;  %p1538_p4 = scmp.lt.s32.totalorder %s1532_s16, %s1532_s16 }
 0x167   :  { %p1539_p5 = por %p1538_p4, %p1537_p3 }
 0x169   :  { %p1540_p6 = pnand %p1539_p5, %p1533_p2 }
 0x1e6   :  { %v1176_v40 = vpop.xlane.xlu0 %1175 }
 0x1e7   :  { %v1177_v20 = vrot.slane %v1176_v40, 4 }
 0x1e9   :  { %v1178_v22 = vadd.f32 %v1177_v20, %v1176_v40 }
 0x1eb   :  { %v1179_v54 = vrot.slane %v1178_v22, 2 }
 0x1ed   :  { %v1180_v56 = vadd.f32 %v1179_v54, %v1178_v22 }
 0x1ef   :  { %v1181_v29 = vrot.slane %v1180_v56, 1 }
 0x1f1   :  { %v1182_v11 = vadd.f32 %v1181_v29, %v1180_v56 }
 0x1f3   :  { %1233 = vpush %v1182_v11 }
 0x224   :  { %s1234_s15 = spop %1233 }
 0x225   :  { %v1184_v62 = vstv %s1234_s15 }
 0x226   :  { %1185 = vst [vmem:[#allocation6] sm:$0xff] %v1184_v62 }
 0x227   :  { %1543 = shalt.err (!%p1540_p6)
}
 0x228   :  { %s1544_s18 = scalar_lea.hbm %s2534_s2, 128 }
 0x229   :  { %p1545_p7 = scmp.ne.s32.totalorder %s2534_s2, %s1544_s18  ;;  %p1548_p8 = scmp.lt.u32.totalorder %s1544_s18, %s2534_s2 }
 0x22b   :  { %p1550_p9 = pnand %p1548_p8, %p1545_p7 }
 0x22d   :  { %1553 = shalt.err (!%p1550_p9)
}
 0x22e   :  { %1207 = dma.vmem_to_hbm [thread:$0]  %s1205_s14, 128, %s2534_s2, [#allocation7]  }
 0x22f   :  { %1556 = dma.done.wait [#allocation4], 512  }
 0x230   :  { %1557 = vsyncadd [#allocation4], 4294966784 }
 0x231   :  { %1558 = dma.done.wait [#allocation7], 128  }
 0x232   :  { %1559 = vsyncadd [#allocation7], 4294967168 }
 0x233   :  { %1214 = vsyncpa [#allocation3], 1 }
 0x234   :  { %1215 = vsyncpa [#allocation4], 1 }
 0x235   :  { %1216 = vsyncpa [#allocation7], 1 }

</bundles_post_ra>
